<compile_context>
chip_gen: v7x
topology: tpu7x:2x2x1
jax: 0.10.0
libtpu: 0.0.40
codegen_flags: <defaults>
</compile_context>

<pallas_src>
import functools

import jax
import jax.numpy as jnp
from jax.experimental import pallas as pl
from jax.experimental.pallas import tpu as pltpu

SELU_ALPHA = 1.6732632423543772
SELU_SCALE = 1.0507009873554805

COMPUTE_DTYPE = jnp.bfloat16   # MXU input dtype (accumulation is f32)
ACT_DTYPE = jnp.bfloat16       # inter-layer activation storage dtype

IMAGE_CHANNELS = 3


def _round_up(x, m):
    return (x + m - 1) // m * m


# --------------------------------------------------------------------------
# In-kernel activation helpers (f32 math)
# --------------------------------------------------------------------------

def _selu_f32(x):
    # clamp the exp argument so the unselected branch never produces inf
    return SELU_SCALE * jnp.where(
        x > 0.0, x, SELU_ALPHA * (jnp.exp(jnp.minimum(x, 0.0)) - 1.0))


def _sigmoid_f32(x):
    # EUP exp + EUP approx reciprocal; clamp so exp never overflows
    return pl.reciprocal(1.0 + jnp.exp(jnp.minimum(-x, 30.0)), approx=True)


# --------------------------------------------------------------------------
# Lane-dense, M-tiled GEMM + bias + activation kernel
# --------------------------------------------------------------------------

def _gemm_kernel(w_ref, x_ref, b_ref, o_ref, *, act):
    acc = jnp.dot(w_ref[...], x_ref[...], preferred_element_type=jnp.float32)
    acc = acc + b_ref[...]                      # (N, 1) broadcast along lanes
    if act == "selu":
        acc = _selu_f32(acc)
    elif act == "sigmoid":
        acc = _sigmoid_f32(acc)
    o_ref[...] = acc.astype(o_ref.dtype)


def _pick_tile_m(m, cap):
    cap = max(128, (cap // 128) * 128)
    m128 = _round_up(m, 128)
    if m128 <= cap:
        return m128                             # single lane-aligned block
    for tm in range(cap, 127, -128):            # limit padding waste to ~12.5%
        if _round_up(m, tm) - m <= tm // 8:
            return tm
    return 128


def matmul_bias_act(w, x, b, act="none", out_dtype=jnp.float32, tile_cap=2048):
    """out(N, M) = W(N, K) @ patches(K, M) + b[:, None], fused activation.

    M (= B*Ho*Wo) is lane-dense and tiled by the grid so the HBM->VMEM DMA of
    the patch matrix pipelines with the MXU; the grid axis is parallel for
    megacore / v7x dual-TC sharding.
    """
    N, K = w.shape
    K2, M = x.shape
    assert K == K2
    tm = _pick_tile_m(M, tile_cap)
    m_pad = _round_up(M, tm)
    if m_pad != M:
        x = jnp.pad(x, ((0, 0), (0, m_pad - M)))
    grid = (m_pad // tm,)
    kernel = functools.partial(_gemm_kernel, act=act)
    out = pl.pallas_call(
        kernel,
        out_shape=jax.ShapeDtypeStruct((N, m_pad), out_dtype),
        grid=grid,
        in_specs=[
            pl.BlockSpec((N, K), lambda i: (0, 0)),     # weights: resident
            pl.BlockSpec((K, tm), lambda i: (0, i)),    # patches: streamed
            pl.BlockSpec((N, 1), lambda i: (0, 0)),     # bias
        ],
        out_specs=pl.BlockSpec((N, tm), lambda i: (0, i)),
        compiler_params=pltpu.CompilerParams(
            dimension_semantics=("parallel",)),
    )(w.astype(COMPUTE_DTYPE), x.astype(COMPUTE_DTYPE),
      b.reshape(N, 1).astype(jnp.float32))
    return out[:, :M] if m_pad != M else out


# --------------------------------------------------------------------------
# Fused latent path: mu/logvar linears + reparameterize + decoder linear+SELU
# --------------------------------------------------------------------------

def _latent_kernel(feats_ref, wle_ref, ble_ref, wlv_ref, blv_ref, eps_ref,
                   wld_ref, bld_ref, mu_ref, logvar_ref, d_ref):
    feats = feats_ref[...]
    mu = jnp.dot(feats, wle_ref[...],
                 preferred_element_type=jnp.float32) + ble_ref[...]
    logvar = jnp.dot(feats, wlv_ref[...],
                     preferred_element_type=jnp.float32) + blv_ref[...]
    std = jnp.exp(0.5 * logvar)
    z = eps_ref[...] * std + mu
    d = jnp.dot(z, wld_ref[...],
                preferred_element_type=jnp.float32) + bld_ref[...]
    mu_ref[...] = mu
    logvar_ref[...] = logvar
    d_ref[...] = _selu_f32(d)


def latent_path(feats, wle, ble, wlv, blv, eps, wld, bld):
    """All latent tensors are tiny; a single Pallas call removes 3 extra
    launches and the HBM round trips of the (B, enc_dims) intermediates."""
    B, Fd = feats.shape
    E = ble.shape[0]
    vmem = pl.BlockSpec(memory_space=pltpu.MemorySpace.VMEM)
    return pl.pallas_call(
        _latent_kernel,
        out_shape=(jax.ShapeDtypeStruct((B, E), jnp.float32),
                   jax.ShapeDtypeStruct((B, E), jnp.float32),
                   jax.ShapeDtypeStruct((B, Fd), jnp.float32)),
        in_specs=[vmem] * 8,
        out_specs=(vmem, vmem, vmem),
    )(feats.astype(jnp.float32), wle, ble.reshape(1, E),
      wlv, blv.reshape(1, E), eps.astype(jnp.float32),
      wld, bld.reshape(1, Fd))


# --------------------------------------------------------------------------
# Conv / ConvTranspose glue (im2col in a transpose-free (C, B, H, W) layout)
# --------------------------------------------------------------------------

def _im2col(x, k, s):
    """x: (C, B, H, W) -> patches (C*k*k, B*Ho*Wo).  K ordering is C-major
    then (kh, kw), matching PyTorch weight.reshape(Cout, Cin*k*k)."""
    C, B, H, W = x.shape
    Ho = (H - k) // s + 1
    Wo = (W - k) // s + 1
    cols = [x[:, :, di:di + s * Ho:s, dj:dj + s * Wo:s]
            for di in range(k) for dj in range(k)]
    patches = jnp.stack(cols, axis=1)                 # (C, k*k, B, Ho, Wo)
    return patches.reshape(C * k * k, B * Ho * Wo), Ho, Wo


def conv2d(x, w, b, stride, act, out_dtype=ACT_DTYPE):
    """Conv2d, PyTorch semantics (no padding).
    x: (Cin, B, H, W), w: (Cout, Cin, k, k) -> (Cout, B, Ho, Wo)."""
    Cout, Cin, k, _ = w.shape
    _, B, H, W = x.shape
    # TODO(synk): fuse im2col into the Pallas kernel (manual DMA of the k*k
    # strided rows) so only the raw activation crosses HBM.
    patches, Ho, Wo = _im2col(x.astype(COMPUTE_DTYPE), k, stride)
    out = matmul_bias_act(w.reshape(Cout, Cin * k * k), patches, b, act,
                          out_dtype=out_dtype)
    return out.reshape(Cout, B, Ho, Wo)


def conv_transpose2d(x, w, b, stride, act, out_dtype=ACT_DTYPE):
    """ConvTranspose2d, PyTorch semantics (no padding / output_padding), via
    phase-packed sub-pixel decomposition: one stride-1 conv whose output
    channels are the s*s output phases (no zero-dilated input).
    x: (Cin, B, H, W), w: (Cin, Cout, k, k) [PyTorch layout]."""
    Cin, Cout, k, _ = w.shape
    _, B, H, W = x.shape
    s = stride
    U = -(-k // s)                     # ceil(k/s): sub-kernel extent per axis
    pad = U - 1
    Ho = (H - 1) * s + k
    Wo = (W - 1) * s + k

    # Phase-packed equivalent conv weight: (s*s*Cout, Cin*U*U).
    # w_conv[ph=(ri,rj), co, ci, u, v] = w[ci, co, ri + s*(U-1-u), rj + s*(U-1-v)]
    w_pad = jnp.pad(w, ((0, 0), (0, 0), (0, s * U - k), (0, s * U - k)))
    w6 = jnp.flip(w_pad.reshape(Cin, Cout, U, s, U, s), axis=(2, 4))
    w_cat = jnp.transpose(w6, (3, 5, 1, 0, 2, 4)).reshape(s * s * Cout,
                                                          Cin * U * U)
    b_cat = jnp.tile(b, s * s)

    xp = jnp.pad(x.astype(COMPUTE_DTYPE),
                 ((0, 0), (0, 0), (pad, pad), (pad, pad)))
    patches, Hp, Wp = _im2col(xp, U, 1)               # Hp = H+U-1, Wp = W+U-1
    out = matmul_bias_act(w_cat, patches, b_cat, act, out_dtype=out_dtype)
    out = out.reshape(s, s, Cout, B, Hp, Wp)

    # Interleave the s*s phases into the full-resolution output.
    y = jnp.zeros((Cout, B, Ho, Wo), out_dtype)
    for ri in range(s):
        for rj in range(s):
            hk = (Ho - ri + s - 1) // s
            wk = (Wo - rj + s - 1) // s
            y = y.at[:, :, ri::s, rj::s].set(out[ri, rj, :, :, :hk, :wk])
    return y


# --------------------------------------------------------------------------
# Model: snconv2_vae
# --------------------------------------------------------------------------

def _encoder_feature_size(h, w):
    for _ in range(4):                                # four stride-2, k=3 convs
        h = (h - 3) // 2 + 1
        w = (w - 3) // 2 + 1
    return (16, h, w)


def init_params(key, enc_dims, feature_dims):
    ks = jax.random.split(key, 32)
    it = iter(range(32))
    rnd = lambda shape: jax.random.normal(ks[next(it)], shape, jnp.float32) * 0.1
    p = {}
    enc_cfg = [(IMAGE_CHANNELS, 2), (2, 4), (4, 8), (8, 16)]
    for n, (cin, cout) in enumerate(enc_cfg, 1):
        p[f"ec{n}_w"] = rnd((cout, cin, 3, 3))
        p[f"ec{n}_b"] = rnd((cout,))
    dec_cfg = [(16, 8, 3), (8, 4, 3), (4, 2, 3), (2, IMAGE_CHANNELS, 4)]
    for n, (cin, cout, k) in enumerate(dec_cfg, 1):
        p[f"dc{n}_w"] = rnd((cin, cout, k, k))        # PyTorch ConvTranspose layout
        p[f"dc{n}_b"] = rnd((cout,))
    p["le_w"] = rnd((feature_dims, enc_dims)); p["le_b"] = rnd((enc_dims,))
    p["lv_w"] = rnd((feature_dims, enc_dims)); p["lv_b"] = rnd((enc_dims,))
    p["ld_w"] = rnd((enc_dims, feature_dims)); p["ld_b"] = rnd((feature_dims,))
    return p


def snconv2_vae_forward(params, x, eps, feature_size):
    B = x.shape[0]
    Cf, Hf, Wf = feature_size
    feature_dims = Cf * Hf * Wf

    # Internal activation layout is (C, B, H, W): the lane-dense GEMM output
    # (Cout, B*Ho*Wo) reshapes straight into it, no per-layer transposes.
    h = jnp.transpose(x, (1, 0, 2, 3))

    # ---- encode (feature_encoder; trailing F.selu fused into conv #4) ----
    h = conv2d(h, params["ec1_w"], params["ec1_b"], 2, "selu")
    h = conv2d(h, params["ec2_w"], params["ec2_b"], 2, "selu")
    h = conv2d(h, params["ec3_w"], params["ec3_b"], 2, "selu")
    h = conv2d(h, params["ec4_w"], params["ec4_b"], 2, "selu")

    # .view(-1, feature_dims) flattens NCHW order (tiny tensor here)
    feats = jnp.transpose(h, (1, 0, 2, 3)).reshape(B, feature_dims)

    # ---- fused latent path: mu/logvar, reparameterize, decoder linear ----
    mu, logvar, d = latent_path(feats, params["le_w"], params["le_b"],
                                params["lv_w"], params["lv_b"], eps,
                                params["ld_w"], params["ld_b"])

    # ---- decode ----
    d = d.reshape(B, Cf, Hf, Wf).transpose(1, 0, 2, 3)
    d = conv_transpose2d(d, params["dc1_w"], params["dc1_b"], 2, "selu")
    d = conv_transpose2d(d, params["dc2_w"], params["dc2_b"], 2, "selu")
    d = conv_transpose2d(d, params["dc3_w"], params["dc3_b"], 2, "selu")
    d = conv_transpose2d(d, params["dc4_w"], params["dc4_b"], 2, "sigmoid",
                         out_dtype=jnp.float32)
    recon = jnp.transpose(d, (1, 0, 2, 3))
    return recon, mu, logvar


# --------------------------------------------------------------------------
# Main
# --------------------------------------------------------------------------

if __name__ == "__main__":
    # Small shapes consistent with the module's 4x(stride-2) encoder /
    # 4x(stride-2) transposed decoder: 48 -> 23 -> 11 -> 5 -> 2 -> ... -> 48.
    batch = 2
    H = W = 48
    encoding_dimensions = 8

    feature_size = _encoder_feature_size(H, W)          # (16, 2, 2)
    feature_dims = feature_size[0] * feature_size[1] * feature_size[2]

    key = jax.random.PRNGKey(0)
    k_params, k_x, k_eps = jax.random.split(key, 3)
    params = init_params(k_params, encoding_dimensions, feature_dims)
    x = jax.random.normal(k_x, (batch, IMAGE_CHANNELS, H, W), jnp.float32)
    # torch.randn_like(std) equivalent (deterministic JAX randomness here)
    eps = jax.random.normal(k_eps, (batch, encoding_dimensions), jnp.float32)

    fwd = jax.jit(functools.partial(snconv2_vae_forward,
                                    feature_size=feature_size))
    recon, mu, logvar = fwd(params, x, eps)
    jax.block_until_ready((recon, mu, logvar))

    assert recon.shape == (batch, IMAGE_CHANNELS, H, W), recon.shape
    assert mu.shape == (batch, encoding_dimensions)
    assert logvar.shape == (batch, encoding_dimensions)
    assert bool(jnp.all(jnp.isfinite(recon)))
    assert bool(jnp.all(jnp.isfinite(mu))) and bool(jnp.all(jnp.isfinite(logvar)))
    print("KERNEL_OK")
</pallas_src>

<mosaic_0001>
module attributes {stable_mosaic.version = 11 : i64} {
  func.func @_gemm_kernel(%arg0: i32, %arg1: memref<2x27xbf16, #tpu.memory_space<vmem>>, %arg2: memref<27x1152xbf16, #tpu.memory_space<vmem>>, %arg3: memref<2x1xf32, #tpu.memory_space<vmem>>, %arg4: memref<2x1152xbf16, #tpu.memory_space<vmem>>) attributes {dimension_semantics = [#tpu.dimension_semantics<parallel>], iteration_bounds = array<i64: 1>, scalar_prefetch = 0 : i64, scratch_operands = 0 : i64, tpu.core_type = #tpu.core_type<tc>, window_params = [{pipeline_mode = #tpu.pipeline_mode<synchronous>, transform_indices = @transform_0, window_bounds = array<i64: 2, 27>}, {transform_indices = @transform_1, window_bounds = array<i64: 27, 1152>}, {pipeline_mode = #tpu.pipeline_mode<synchronous>, transform_indices = @transform_2, window_bounds = array<i64: 2, 1>}, {transform_indices = @transform_3, window_bounds = array<i64: 2, 1152>}]} {
    %c0 = arith.constant 0 : index
    %c0_0 = arith.constant 0 : index
    %0 = vector.load %arg1[%c0, %c0_0] : memref<2x27xbf16, #tpu.memory_space<vmem>>, vector<2x27xbf16>
    %c0_1 = arith.constant 0 : index
    %c0_2 = arith.constant 0 : index
    %1 = vector.load %arg2[%c0_1, %c0_2] : memref<27x1152xbf16, #tpu.memory_space<vmem>>, vector<27x1152xbf16>
    %cst = arith.constant dense<0.000000e+00> : vector<2x1152xf32>
    %2 = tpu.matmul %0, %1, %cst {dimension_numbers = #tpu.dot_dimension_numbers<[1], [0], [0], [1], [0, 0, 1, 1], [], []>} : vector<2x27xbf16>, vector<27x1152xbf16>, vector<2x1152xf32> -> vector<2x1152xf32>
    %c0_3 = arith.constant 0 : index
    %c0_4 = arith.constant 0 : index
    %3 = vector.load %arg3[%c0_3, %c0_4] : memref<2x1xf32, #tpu.memory_space<vmem>>, vector<2x1xf32>
    %4 = vector.broadcast %3 : vector<2x1xf32> to vector<2x1152xf32>
    %5 = arith.addf %2, %4 : vector<2x1152xf32>
    %cst_5 = arith.constant 0.000000e+00 : f32
    %6 = vector.broadcast %cst_5 : f32 to vector<2x1152xf32>
    %7 = arith.cmpf ogt, %5, %6 : vector<2x1152xf32>
    %cst_6 = arith.constant 0.000000e+00 : f32
    %8 = vector.broadcast %cst_6 : f32 to vector<2x1152xf32>
    %9 = arith.minimumf %5, %8 : vector<2x1152xf32>
    %10 = math.exp %9 : vector<2x1152xf32>
    %cst_7 = arith.constant 1.000000e+00 : f32
    %11 = vector.broadcast %cst_7 : f32 to vector<2x1152xf32>
    %12 = arith.subf %10, %11 : vector<2x1152xf32>
    %cst_8 = arith.constant 1.67326319 : f32
    %13 = vector.broadcast %cst_8 : f32 to vector<2x1152xf32>
    %14 = arith.mulf %13, %12 : vector<2x1152xf32>
    %15 = arith.select %7, %5, %14 : vector<2x1152xi1>, vector<2x1152xf32>
    %cst_9 = arith.constant 1.05070102 : f32
    %16 = vector.broadcast %cst_9 : f32 to vector<2x1152xf32>
    %17 = arith.mulf %16, %15 : vector<2x1152xf32>
    %18 = arith.truncf %17 : vector<2x1152xf32> to vector<2x1152xbf16>
    %c0_10 = arith.constant 0 : index
    %c0_11 = arith.constant 0 : index
    %19 = vector.load %arg4[%c0_10, %c0_11] : memref<2x1152xbf16, #tpu.memory_space<vmem>>, vector<2x1152xbf16>
    tpu.vector_store %arg4[%c0_10, %c0_11], %18 {strides = array<i32>} : memref<2x1152xbf16, #tpu.memory_space<vmem>>, vector<2x1152xbf16>,
    return
  }
  func.func @transform_0(%arg0: i32) -> (i32, i32) {
    %c0_i32 = arith.constant 0 : i32
    %c0_i32_0 = arith.constant 0 : i32
    %c0_i32_1 = arith.constant 0 : i32
    return %c0_i32, %c0_i32_0 : i32, i32
  }
  func.func @transform_1(%arg0: i32) -> (i32, i32) {
    %c0_i32 = arith.constant 0 : i32
    %c0_i32_0 = arith.constant 0 : i32
    return %c0_i32, %arg0 : i32, i32
  }
  func.func @transform_2(%arg0: i32) -> (i32, i32) {
    %c0_i32 = arith.constant 0 : i32
    %c0_i32_0 = arith.constant 0 : i32
    %c0_i32_1 = arith.constant 0 : i32
    return %c0_i32, %c0_i32_0 : i32, i32
  }
  func.func @transform_3(%arg0: i32) -> (i32, i32) {
    %c0_i32 = arith.constant 0 : i32
    %c0_i32_0 = arith.constant 0 : i32
    return %c0_i32, %arg0 : i32, i32
  }
}

module attributes {stable_mosaic.version = 11 : i64} {
  func.func @_gemm_kernel(%arg0: i32, %arg1: memref<4x18xbf16, #tpu.memory_space<vmem>>, %arg2: memref<18x256xbf16, #tpu.memory_space<vmem>>, %arg3: memref<4x1xf32, #tpu.memory_space<vmem>>, %arg4: memref<4x256xbf16, #tpu.memory_space<vmem>>) attributes {dimension_semantics = [#tpu.dimension_semantics<parallel>], iteration_bounds = array<i64: 1>, scalar_prefetch = 0 : i64, scratch_operands = 0 : i64, tpu.core_type = #tpu.core_type<tc>, window_params = [{pipeline_mode = #tpu.pipeline_mode<synchronous>, transform_indices = @transform_0, window_bounds = array<i64: 4, 18>}, {transform_indices = @transform_1, window_bounds = array<i64: 18, 256>}, {pipeline_mode = #tpu.pipeline_mode<synchronous>, transform_indices = @transform_2, window_bounds = array<i64: 4, 1>}, {transform_indices = @transform_3, window_bounds = array<i64: 4, 256>}]} {
    %c0 = arith.constant 0 : index
    %c0_0 = arith.constant 0 : index
    %0 = vector.load %arg1[%c0, %c0_0] : memref<4x18xbf16, #tpu.memory_space<vmem>>, vector<4x18xbf16>
    %c0_1 = arith.constant 0 : index
    %c0_2 = arith.constant 0 : index
    %1 = vector.load %arg2[%c0_1, %c0_2] : memref<18x256xbf16, #tpu.memory_space<vmem>>, vector<18x256xbf16>
    %cst = arith.constant dense<0.000000e+00> : vector<4x256xf32>
    %2 = tpu.matmul %0, %1, %cst {dimension_numbers = #tpu.dot_dimension_numbers<[1], [0], [0], [1], [0, 0, 1, 1], [], []>} : vector<4x18xbf16>, vector<18x256xbf16>, vector<4x256xf32> -> vector<4x256xf32>
    %c0_3 = arith.constant 0 : index
    %c0_4 = arith.constant 0 : index
    %3 = vector.load %arg3[%c0_3, %c0_4] : memref<4x1xf32, #tpu.memory_space<vmem>>, vector<4x1xf32>
    %4 = vector.broadcast %3 : vector<4x1xf32> to vector<4x256xf32>
    %5 = arith.addf %2, %4 : vector<4x256xf32>
    %cst_5 = arith.constant 0.000000e+00 : f32
    %6 = vector.broadcast %cst_5 : f32 to vector<4x256xf32>
    %7 = arith.cmpf ogt, %5, %6 : vector<4x256xf32>
    %cst_6 = arith.constant 0.000000e+00 : f32
    %8 = vector.broadcast %cst_6 : f32 to vector<4x256xf32>
    %9 = arith.minimumf %5, %8 : vector<4x256xf32>
    %10 = math.exp %9 : vector<4x256xf32>
    %cst_7 = arith.constant 1.000000e+00 : f32
    %11 = vector.broadcast %cst_7 : f32 to vector<4x256xf32>
    %12 = arith.subf %10, %11 : vector<4x256xf32>
    %cst_8 = arith.constant 1.67326319 : f32
    %13 = vector.broadcast %cst_8 : f32 to vector<4x256xf32>
    %14 = arith.mulf %13, %12 : vector<4x256xf32>
    %15 = arith.select %7, %5, %14 : vector<4x256xi1>, vector<4x256xf32>
    %cst_9 = arith.constant 1.05070102 : f32
    %16 = vector.broadcast %cst_9 : f32 to vector<4x256xf32>
    %17 = arith.mulf %16, %15 : vector<4x256xf32>
    %18 = arith.truncf %17 : vector<4x256xf32> to vector<4x256xbf16>
    %c0_10 = arith.constant 0 : index
    %c0_11 = arith.constant 0 : index
    %19 = vector.load %arg4[%c0_10, %c0_11] : memref<4x256xbf16, #tpu.memory_space<vmem>>, vector<4x256xbf16>
    tpu.vector_store %arg4[%c0_10, %c0_11], %18 {strides = array<i32>} : memref<4x256xbf16, #tpu.memory_space<vmem>>, vector<4x256xbf16>,
    return
  }
  func.func @transform_0(%arg0: i32) -> (i32, i32) {
    %c0_i32 = arith.constant 0 : i32
    %c0_i32_0 = arith.constant 0 : i32
    %c0_i32_1 = arith.constant 0 : i32
    return %c0_i32, %c0_i32_0 : i32, i32
  }
  func.func @transform_1(%arg0: i32) -> (i32, i32) {
    %c0_i32 = arith.constant 0 : i32
    %c0_i32_0 = arith.constant 0 : i32
    return %c0_i32, %arg0 : i32, i32
  }
  func.func @transform_2(%arg0: i32) -> (i32, i32) {
    %c0_i32 = arith.constant 0 : i32
    %c0_i32_0 = arith.constant 0 : i32
    %c0_i32_1 = arith.constant 0 : i32
    return %c0_i32, %c0_i32_0 : i32, i32
  }
  func.func @transform_3(%arg0: i32) -> (i32, i32) {
    %c0_i32 = arith.constant 0 : i32
    %c0_i32_0 = arith.constant 0 : i32
    return %c0_i32, %arg0 : i32, i32
  }
}

module attributes {stable_mosaic.version = 11 : i64} {
  func.func @_gemm_kernel(%arg0: i32, %arg1: memref<8x36xbf16, #tpu.memory_space<vmem>>, %arg2: memref<36x128xbf16, #tpu.memory_space<vmem>>, %arg3: memref<8x1xf32, #tpu.memory_space<vmem>>, %arg4: memref<8x128xbf16, #tpu.memory_space<vmem>>) attributes {dimension_semantics = [#tpu.dimension_semantics<parallel>], iteration_bounds = array<i64: 1>, scalar_prefetch = 0 : i64, scratch_operands = 0 : i64, tpu.core_type = #tpu.core_type<tc>, window_params = [{pipeline_mode = #tpu.pipeline_mode<synchronous>, transform_indices = @transform_0, window_bounds = array<i64: 8, 36>}, {transform_indices = @transform_1, window_bounds = array<i64: 36, 128>}, {pipeline_mode = #tpu.pipeline_mode<synchronous>, transform_indices = @transform_2, window_bounds = array<i64: 8, 1>}, {transform_indices = @transform_3, window_bounds = array<i64: 8, 128>}]} {
    %c0 = arith.constant 0 : index
    %c0_0 = arith.constant 0 : index
    %0 = vector.load %arg1[%c0, %c0_0] : memref<8x36xbf16, #tpu.memory_space<vmem>>, vector<8x36xbf16>
    %c0_1 = arith.constant 0 : index
    %c0_2 = arith.constant 0 : index
    %1 = vector.load %arg2[%c0_1, %c0_2] : memref<36x128xbf16, #tpu.memory_space<vmem>>, vector<36x128xbf16>
    %cst = arith.constant dense<0.000000e+00> : vector<8x128xf32>
    %2 = tpu.matmul %0, %1, %cst {dimension_numbers = #tpu.dot_dimension_numbers<[1], [0], [0], [1], [0, 0, 1, 1], [], []>} : vector<8x36xbf16>, vector<36x128xbf16>, vector<8x128xf32> -> vector<8x128xf32>
    %c0_3 = arith.constant 0 : index
    %c0_4 = arith.constant 0 : index
    %3 = vector.load %arg3[%c0_3, %c0_4] : memref<8x1xf32, #tpu.memory_space<vmem>>, vector<8x1xf32>
    %4 = vector.broadcast %3 : vector<8x1xf32> to vector<8x128xf32>
    %5 = arith.addf %2, %4 : vector<8x128xf32>
    %cst_5 = arith.constant 0.000000e+00 : f32
    %6 = vector.broadcast %cst_5 : f32 to vector<8x128xf32>
    %7 = arith.cmpf ogt, %5, %6 : vector<8x128xf32>
    %cst_6 = arith.constant 0.000000e+00 : f32
    %8 = vector.broadcast %cst_6 : f32 to vector<8x128xf32>
    %9 = arith.minimumf %5, %8 : vector<8x128xf32>
    %10 = math.exp %9 : vector<8x128xf32>
    %cst_7 = arith.constant 1.000000e+00 : f32
    %11 = vector.broadcast %cst_7 : f32 to vector<8x128xf32>
    %12 = arith.subf %10, %11 : vector<8x128xf32>
    %cst_8 = arith.constant 1.67326319 : f32
    %13 = vector.broadcast %cst_8 : f32 to vector<8x128xf32>
    %14 = arith.mulf %13, %12 : vector<8x128xf32>
    %15 = arith.select %7, %5, %14 : vector<8x128xi1>, vector<8x128xf32>
    %cst_9 = arith.constant 1.05070102 : f32
    %16 = vector.broadcast %cst_9 : f32 to vector<8x128xf32>
    %17 = arith.mulf %16, %15 : vector<8x128xf32>
    %18 = arith.truncf %17 : vector<8x128xf32> to vector<8x128xbf16>
    %c0_10 = arith.constant 0 : index
    %c0_11 = arith.constant 0 : index
    %19 = vector.load %arg4[%c0_10, %c0_11] : memref<8x128xbf16, #tpu.memory_space<vmem>>, vector<8x128xbf16>
    tpu.vector_store %arg4[%c0_10, %c0_11], %18 {strides = array<i32>} : memref<8x128xbf16, #tpu.memory_space<vmem>>, vector<8x128xbf16>,
    return
  }
  func.func @transform_0(%arg0: i32) -> (i32, i32) {
    %c0_i32 = arith.constant 0 : i32
    %c0_i32_0 = arith.constant 0 : i32
    %c0_i32_1 = arith.constant 0 : i32
    return %c0_i32, %c0_i32_0 : i32, i32
  }
  func.func @transform_1(%arg0: i32) -> (i32, i32) {
    %c0_i32 = arith.constant 0 : i32
    %c0_i32_0 = arith.constant 0 : i32
    return %c0_i32, %arg0 : i32, i32
  }
  func.func @transform_2(%arg0: i32) -> (i32, i32) {
    %c0_i32 = arith.constant 0 : i32
    %c0_i32_0 = arith.constant 0 : i32
    %c0_i32_1 = arith.constant 0 : i32
    return %c0_i32, %c0_i32_0 : i32, i32
  }
  func.func @transform_3(%arg0: i32) -> (i32, i32) {
    %c0_i32 = arith.constant 0 : i32
    %c0_i32_0 = arith.constant 0 : i32
    return %c0_i32, %arg0 : i32, i32
  }
}

module attributes {stable_mosaic.version = 11 : i64} {
  func.func @_gemm_kernel(%arg0: i32, %arg1: memref<16x72xbf16, #tpu.memory_space<vmem>>, %arg2: memref<72x128xbf16, #tpu.memory_space<vmem>>, %arg3: memref<16x1xf32, #tpu.memory_space<vmem>>, %arg4: memref<16x128xbf16, #tpu.memory_space<vmem>>) attributes {dimension_semantics = [#tpu.dimension_semantics<parallel>], iteration_bounds = array<i64: 1>, scalar_prefetch = 0 : i64, scratch_operands = 0 : i64, tpu.core_type = #tpu.core_type<tc>, window_params = [{pipeline_mode = #tpu.pipeline_mode<synchronous>, transform_indices = @transform_0, window_bounds = array<i64: 16, 72>}, {transform_indices = @transform_1, window_bounds = array<i64: 72, 128>}, {pipeline_mode = #tpu.pipeline_mode<synchronous>, transform_indices = @transform_2, window_bounds = array<i64: 16, 1>}, {transform_indices = @transform_3, window_bounds = array<i64: 16, 128>}]} {
    %c0 = arith.constant 0 : index
    %c0_0 = arith.constant 0 : index
    %0 = vector.load %arg1[%c0, %c0_0] : memref<16x72xbf16, #tpu.memory_space<vmem>>, vector<16x72xbf16>
    %c0_1 = arith.constant 0 : index
    %c0_2 = arith.constant 0 : index
    %1 = vector.load %arg2[%c0_1, %c0_2] : memref<72x128xbf16, #tpu.memory_space<vmem>>, vector<72x128xbf16>
    %cst = arith.constant dense<0.000000e+00> : vector<16x128xf32>
    %2 = tpu.matmul %0, %1, %cst {dimension_numbers = #tpu.dot_dimension_numbers<[1], [0], [0], [1], [0, 0, 1, 1], [], []>} : vector<16x72xbf16>, vector<72x128xbf16>, vector<16x128xf32> -> vector<16x128xf32>
    %c0_3 = arith.constant 0 : index
    %c0_4 = arith.constant 0 : index
    %3 = vector.load %arg3[%c0_3, %c0_4] : memref<16x1xf32, #tpu.memory_space<vmem>>, vector<16x1xf32>
    %4 = vector.broadcast %3 : vector<16x1xf32> to vector<16x128xf32>
    %5 = arith.addf %2, %4 : vector<16x128xf32>
    %cst_5 = arith.constant 0.000000e+00 : f32
    %6 = vector.broadcast %cst_5 : f32 to vector<16x128xf32>
    %7 = arith.cmpf ogt, %5, %6 : vector<16x128xf32>
    %cst_6 = arith.constant 0.000000e+00 : f32
    %8 = vector.broadcast %cst_6 : f32 to vector<16x128xf32>
    %9 = arith.minimumf %5, %8 : vector<16x128xf32>
    %10 = math.exp %9 : vector<16x128xf32>
    %cst_7 = arith.constant 1.000000e+00 : f32
    %11 = vector.broadcast %cst_7 : f32 to vector<16x128xf32>
    %12 = arith.subf %10, %11 : vector<16x128xf32>
    %cst_8 = arith.constant 1.67326319 : f32
    %13 = vector.broadcast %cst_8 : f32 to vector<16x128xf32>
    %14 = arith.mulf %13, %12 : vector<16x128xf32>
    %15 = arith.select %7, %5, %14 : vector<16x128xi1>, vector<16x128xf32>
    %cst_9 = arith.constant 1.05070102 : f32
    %16 = vector.broadcast %cst_9 : f32 to vector<16x128xf32>
    %17 = arith.mulf %16, %15 : vector<16x128xf32>
    %18 = arith.truncf %17 : vector<16x128xf32> to vector<16x128xbf16>
    %c0_10 = arith.constant 0 : index
    %c0_11 = arith.constant 0 : index
    %19 = vector.load %arg4[%c0_10, %c0_11] : memref<16x128xbf16, #tpu.memory_space<vmem>>, vector<16x128xbf16>
    tpu.vector_store %arg4[%c0_10, %c0_11], %18 {strides = array<i32>} : memref<16x128xbf16, #tpu.memory_space<vmem>>, vector<16x128xbf16>,
    return
  }
  func.func @transform_0(%arg0: i32) -> (i32, i32) {
    %c0_i32 = arith.constant 0 : i32
    %c0_i32_0 = arith.constant 0 : i32
    %c0_i32_1 = arith.constant 0 : i32
    return %c0_i32, %c0_i32_0 : i32, i32
  }
  func.func @transform_1(%arg0: i32) -> (i32, i32) {
    %c0_i32 = arith.constant 0 : i32
    %c0_i32_0 = arith.constant 0 : i32
    return %c0_i32, %arg0 : i32, i32
  }
  func.func @transform_2(%arg0: i32) -> (i32, i32) {
    %c0_i32 = arith.constant 0 : i32
    %c0_i32_0 = arith.constant 0 : i32
    %c0_i32_1 = arith.constant 0 : i32
    return %c0_i32, %c0_i32_0 : i32, i32
  }
  func.func @transform_3(%arg0: i32) -> (i32, i32) {
    %c0_i32 = arith.constant 0 : i32
    %c0_i32_0 = arith.constant 0 : i32
    return %c0_i32, %arg0 : i32, i32
  }
}

module attributes {stable_mosaic.version = 11 : i64} {
  func.func @_latent_kernel(%arg0: memref<2x64xf32, #tpu.memory_space<vmem>>, %arg1: memref<64x8xf32, #tpu.memory_space<vmem>>, %arg2: memref<1x8xf32, #tpu.memory_space<vmem>>, %arg3: memref<64x8xf32, #tpu.memory_space<vmem>>, %arg4: memref<1x8xf32, #tpu.memory_space<vmem>>, %arg5: memref<2x8xf32, #tpu.memory_space<vmem>>, %arg6: memref<8x64xf32, #tpu.memory_space<vmem>>, %arg7: memref<1x64xf32, #tpu.memory_space<vmem>>, %arg8: memref<2x8xf32, #tpu.memory_space<vmem>>, %arg9: memref<2x8xf32, #tpu.memory_space<vmem>>, %arg10: memref<2x64xf32, #tpu.memory_space<vmem>>) attributes {dimension_semantics = [], scalar_prefetch = 0 : i64, scratch_operands = 0 : i64, tpu.core_type = #tpu.core_type<tc>} {
    %c0 = arith.constant 0 : index
    %c0_0 = arith.constant 0 : index
    %0 = vector.load %arg0[%c0, %c0_0] : memref<2x64xf32, #tpu.memory_space<vmem>>, vector<2x64xf32>
    %c0_1 = arith.constant 0 : index
    %c0_2 = arith.constant 0 : index
    %1 = vector.load %arg1[%c0_1, %c0_2] : memref<64x8xf32, #tpu.memory_space<vmem>>, vector<64x8xf32>
    %cst = arith.constant dense<0.000000e+00> : vector<2x8xf32>
    %2 = tpu.matmul %0, %1, %cst {dimension_numbers = #tpu.dot_dimension_numbers<[1], [0], [0], [1], [0, 0, 1, 1], [], []>} : vector<2x64xf32>, vector<64x8xf32>, vector<2x8xf32> -> vector<2x8xf32>
    %c0_3 = arith.constant 0 : index
    %c0_4 = arith.constant 0 : index
    %3 = vector.load %arg2[%c0_3, %c0_4] : memref<1x8xf32, #tpu.memory_space<vmem>>, vector<1x8xf32>
    %4 = vector.broadcast %3 : vector<1x8xf32> to vector<2x8xf32>
    %5 = arith.addf %2, %4 : vector<2x8xf32>
    %c0_5 = arith.constant 0 : index
    %c0_6 = arith.constant 0 : index
    %6 = vector.load %arg3[%c0_5, %c0_6] : memref<64x8xf32, #tpu.memory_space<vmem>>, vector<64x8xf32>
    %cst_7 = arith.constant dense<0.000000e+00> : vector<2x8xf32>
    %7 = tpu.matmul %0, %6, %cst_7 {dimension_numbers = #tpu.dot_dimension_numbers<[1], [0], [0], [1], [0, 0, 1, 1], [], []>} : vector<2x64xf32>, vector<64x8xf32>, vector<2x8xf32> -> vector<2x8xf32>
    %c0_8 = arith.constant 0 : index
    %c0_9 = arith.constant 0 : index
    %8 = vector.load %arg4[%c0_8, %c0_9] : memref<1x8xf32, #tpu.memory_space<vmem>>, vector<1x8xf32>
    %9 = vector.broadcast %8 : vector<1x8xf32> to vector<2x8xf32>
    %10 = arith.addf %7, %9 : vector<2x8xf32>
    %cst_10 = arith.constant 5.000000e-01 : f32
    %11 = vector.broadcast %cst_10 : f32 to vector<2x8xf32>
    %12 = arith.mulf %11, %10 : vector<2x8xf32>
    %13 = math.exp %12 : vector<2x8xf32>
    %c0_11 = arith.constant 0 : index
    %c0_12 = arith.constant 0 : index
    %14 = vector.load %arg5[%c0_11, %c0_12] : memref<2x8xf32, #tpu.memory_space<vmem>>, vector<2x8xf32>
    %15 = arith.mulf %14, %13 : vector<2x8xf32>
    %16 = arith.addf %15, %5 : vector<2x8xf32>
    %c0_13 = arith.constant 0 : index
    %c0_14 = arith.constant 0 : index
    %17 = vector.load %arg6[%c0_13, %c0_14] : memref<8x64xf32, #tpu.memory_space<vmem>>, vector<8x64xf32>
    %cst_15 = arith.constant dense<0.000000e+00> : vector<2x64xf32>
    %18 = tpu.matmul %16, %17, %cst_15 {dimension_numbers = #tpu.dot_dimension_numbers<[1], [0], [0], [1], [0, 0, 1, 1], [], []>} : vector<2x8xf32>, vector<8x64xf32>, vector<2x64xf32> -> vector<2x64xf32>
    %c0_16 = arith.constant 0 : index
    %c0_17 = arith.constant 0 : index
    %19 = vector.load %arg7[%c0_16, %c0_17] : memref<1x64xf32, #tpu.memory_space<vmem>>, vector<1x64xf32>
    %20 = vector.broadcast %19 : vector<1x64xf32> to vector<2x64xf32>
    %21 = arith.addf %18, %20 : vector<2x64xf32>
    %c0_18 = arith.constant 0 : index
    %c0_19 = arith.constant 0 : index
    %22 = vector.load %arg8[%c0_18, %c0_19] : memref<2x8xf32, #tpu.memory_space<vmem>>, vector<2x8xf32>
    tpu.vector_store %arg8[%c0_18, %c0_19], %5 {strides = array<i32>} : memref<2x8xf32, #tpu.memory_space<vmem>>, vector<2x8xf32>,
    %c0_20 = arith.constant 0 : index
    %c0_21 = arith.constant 0 : index
    %23 = vector.load %arg9[%c0_20, %c0_21] : memref<2x8xf32, #tpu.memory_space<vmem>>, vector<2x8xf32>
    tpu.vector_store %arg9[%c0_20, %c0_21], %10 {strides = array<i32>} : memref<2x8xf32, #tpu.memory_space<vmem>>, vector<2x8xf32>,
    %cst_22 = arith.constant 0.000000e+00 : f32
    %24 = vector.broadcast %cst_22 : f32 to vector<2x64xf32>
    %25 = arith.cmpf ogt, %21, %24 : vector<2x64xf32>
    %cst_23 = arith.constant 0.000000e+00 : f32
    %26 = vector.broadcast %cst_23 : f32 to vector<2x64xf32>
    %27 = arith.minimumf %21, %26 : vector<2x64xf32>
    %28 = math.exp %27 : vector<2x64xf32>
    %cst_24 = arith.constant 1.000000e+00 : f32
    %29 = vector.broadcast %cst_24 : f32 to vector<2x64xf32>
    %30 = arith.subf %28, %29 : vector<2x64xf32>
    %cst_25 = arith.constant 1.67326319 : f32
    %31 = vector.broadcast %cst_25 : f32 to vector<2x64xf32>
    %32 = arith.mulf %31, %30 : vector<2x64xf32>
    %33 = arith.select %25, %21, %32 : vector<2x64xi1>, vector<2x64xf32>
    %cst_26 = arith.constant 1.05070102 : f32
    %34 = vector.broadcast %cst_26 : f32 to vector<2x64xf32>
    %35 = arith.mulf %34, %33 : vector<2x64xf32>
    %c0_27 = arith.constant 0 : index
    %c0_28 = arith.constant 0 : index
    %36 = vector.load %arg10[%c0_27, %c0_28] : memref<2x64xf32, #tpu.memory_space<vmem>>, vector<2x64xf32>
    tpu.vector_store %arg10[%c0_27, %c0_28], %35 {strides = array<i32>} : memref<2x64xf32, #tpu.memory_space<vmem>>, vector<2x64xf32>,
    return
  }
}

module attributes {stable_mosaic.version = 11 : i64} {
  func.func @_gemm_kernel(%arg0: i32, %arg1: memref<32x64xbf16, #tpu.memory_space<vmem>>, %arg2: memref<64x128xbf16, #tpu.memory_space<vmem>>, %arg3: memref<32x1xf32, #tpu.memory_space<vmem>>, %arg4: memref<32x128xbf16, #tpu.memory_space<vmem>>) attributes {dimension_semantics = [#tpu.dimension_semantics<parallel>], iteration_bounds = array<i64: 1>, scalar_prefetch = 0 : i64, scratch_operands = 0 : i64, tpu.core_type = #tpu.core_type<tc>, window_params = [{pipeline_mode = #tpu.pipeline_mode<synchronous>, transform_indices = @transform_0, window_bounds = array<i64: 32, 64>}, {transform_indices = @transform_1, window_bounds = array<i64: 64, 128>}, {pipeline_mode = #tpu.pipeline_mode<synchronous>, transform_indices = @transform_2, window_bounds = array<i64: 32, 1>}, {transform_indices = @transform_3, window_bounds = array<i64: 32, 128>}]} {
    %c0 = arith.constant 0 : index
    %c0_0 = arith.constant 0 : index
    %0 = vector.load %arg1[%c0, %c0_0] : memref<32x64xbf16, #tpu.memory_space<vmem>>, vector<32x64xbf16>
    %c0_1 = arith.constant 0 : index
    %c0_2 = arith.constant 0 : index
    %1 = vector.load %arg2[%c0_1, %c0_2] : memref<64x128xbf16, #tpu.memory_space<vmem>>, vector<64x128xbf16>
    %cst = arith.constant dense<0.000000e+00> : vector<32x128xf32>
    %2 = tpu.matmul %0, %1, %cst {dimension_numbers = #tpu.dot_dimension_numbers<[1], [0], [0], [1], [0, 0, 1, 1], [], []>} : vector<32x64xbf16>, vector<64x128xbf16>, vector<32x128xf32> -> vector<32x128xf32>
    %c0_3 = arith.constant 0 : index
    %c0_4 = arith.constant 0 : index
    %3 = vector.load %arg3[%c0_3, %c0_4] : memref<32x1xf32, #tpu.memory_space<vmem>>, vector<32x1xf32>
    %4 = vector.broadcast %3 : vector<32x1xf32> to vector<32x128xf32>
    %5 = arith.addf %2, %4 : vector<32x128xf32>
    %cst_5 = arith.constant 0.000000e+00 : f32
    %6 = vector.broadcast %cst_5 : f32 to vector<32x128xf32>
    %7 = arith.cmpf ogt, %5, %6 : vector<32x128xf32>
    %cst_6 = arith.constant 0.000000e+00 : f32
    %8 = vector.broadcast %cst_6 : f32 to vector<32x128xf32>
    %9 = arith.minimumf %5, %8 : vector<32x128xf32>
    %10 = math.exp %9 : vector<32x128xf32>
    %cst_7 = arith.constant 1.000000e+00 : f32
    %11 = vector.broadcast %cst_7 : f32 to vector<32x128xf32>
    %12 = arith.subf %10, %11 : vector<32x128xf32>
    %cst_8 = arith.constant 1.67326319 : f32
    %13 = vector.broadcast %cst_8 : f32 to vector<32x128xf32>
    %14 = arith.mulf %13, %12 : vector<32x128xf32>
    %15 = arith.select %7, %5, %14 : vector<32x128xi1>, vector<32x128xf32>
    %cst_9 = arith.constant 1.05070102 : f32
    %16 = vector.broadcast %cst_9 : f32 to vector<32x128xf32>
    %17 = arith.mulf %16, %15 : vector<32x128xf32>
    %18 = arith.truncf %17 : vector<32x128xf32> to vector<32x128xbf16>
    %c0_10 = arith.constant 0 : index
    %c0_11 = arith.constant 0 : index
    %19 = vector.load %arg4[%c0_10, %c0_11] : memref<32x128xbf16, #tpu.memory_space<vmem>>, vector<32x128xbf16>
    tpu.vector_store %arg4[%c0_10, %c0_11], %18 {strides = array<i32>} : memref<32x128xbf16, #tpu.memory_space<vmem>>, vector<32x128xbf16>,
    return
  }
  func.func @transform_0(%arg0: i32) -> (i32, i32) {
    %c0_i32 = arith.constant 0 : i32
    %c0_i32_0 = arith.constant 0 : i32
    %c0_i32_1 = arith.constant 0 : i32
    return %c0_i32, %c0_i32_0 : i32, i32
  }
  func.func @transform_1(%arg0: i32) -> (i32, i32) {
    %c0_i32 = arith.constant 0 : i32
    %c0_i32_0 = arith.constant 0 : i32
    return %c0_i32, %arg0 : i32, i32
  }
  func.func @transform_2(%arg0: i32) -> (i32, i32) {
    %c0_i32 = arith.constant 0 : i32
    %c0_i32_0 = arith.constant 0 : i32
    %c0_i32_1 = arith.constant 0 : i32
    return %c0_i32, %c0_i32_0 : i32, i32
  }
  func.func @transform_3(%arg0: i32) -> (i32, i32) {
    %c0_i32 = arith.constant 0 : i32
    %c0_i32_0 = arith.constant 0 : i32
    return %c0_i32, %arg0 : i32, i32
  }
}

module attributes {stable_mosaic.version = 11 : i64} {
  func.func @_gemm_kernel(%arg0: i32, %arg1: memref<16x32xbf16, #tpu.memory_space<vmem>>, %arg2: memref<32x128xbf16, #tpu.memory_space<vmem>>, %arg3: memref<16x1xf32, #tpu.memory_space<vmem>>, %arg4: memref<16x128xbf16, #tpu.memory_space<vmem>>) attributes {dimension_semantics = [#tpu.dimension_semantics<parallel>], iteration_bounds = array<i64: 1>, scalar_prefetch = 0 : i64, scratch_operands = 0 : i64, tpu.core_type = #tpu.core_type<tc>, window_params = [{pipeline_mode = #tpu.pipeline_mode<synchronous>, transform_indices = @transform_0, window_bounds = array<i64: 16, 32>}, {transform_indices = @transform_1, window_bounds = array<i64: 32, 128>}, {pipeline_mode = #tpu.pipeline_mode<synchronous>, transform_indices = @transform_2, window_bounds = array<i64: 16, 1>}, {transform_indices = @transform_3, window_bounds = array<i64: 16, 128>}]} {
    %c0 = arith.constant 0 : index
    %c0_0 = arith.constant 0 : index
    %0 = vector.load %arg1[%c0, %c0_0] : memref<16x32xbf16, #tpu.memory_space<vmem>>, vector<16x32xbf16>
    %c0_1 = arith.constant 0 : index
    %c0_2 = arith.constant 0 : index
    %1 = vector.load %arg2[%c0_1, %c0_2] : memref<32x128xbf16, #tpu.memory_space<vmem>>, vector<32x128xbf16>
    %cst = arith.constant dense<0.000000e+00> : vector<16x128xf32>
    %2 = tpu.matmul %0, %1, %cst {dimension_numbers = #tpu.dot_dimension_numbers<[1], [0], [0], [1], [0, 0, 1, 1], [], []>} : vector<16x32xbf16>, vector<32x128xbf16>, vector<16x128xf32> -> vector<16x128xf32>
    %c0_3 = arith.constant 0 : index
    %c0_4 = arith.constant 0 : index
    %3 = vector.load %arg3[%c0_3, %c0_4] : memref<16x1xf32, #tpu.memory_space<vmem>>, vector<16x1xf32>
    %4 = vector.broadcast %3 : vector<16x1xf32> to vector<16x128xf32>
    %5 = arith.addf %2, %4 : vector<16x128xf32>
    %cst_5 = arith.constant 0.000000e+00 : f32
    %6 = vector.broadcast %cst_5 : f32 to vector<16x128xf32>
    %7 = arith.cmpf ogt, %5, %6 : vector<16x128xf32>
    %cst_6 = arith.constant 0.000000e+00 : f32
    %8 = vector.broadcast %cst_6 : f32 to vector<16x128xf32>
    %9 = arith.minimumf %5, %8 : vector<16x128xf32>
    %10 = math.exp %9 : vector<16x128xf32>
    %cst_7 = arith.constant 1.000000e+00 : f32
    %11 = vector.broadcast %cst_7 : f32 to vector<16x128xf32>
    %12 = arith.subf %10, %11 : vector<16x128xf32>
    %cst_8 = arith.constant 1.67326319 : f32
    %13 = vector.broadcast %cst_8 : f32 to vector<16x128xf32>
    %14 = arith.mulf %13, %12 : vector<16x128xf32>
    %15 = arith.select %7, %5, %14 : vector<16x128xi1>, vector<16x128xf32>
    %cst_9 = arith.constant 1.05070102 : f32
    %16 = vector.broadcast %cst_9 : f32 to vector<16x128xf32>
    %17 = arith.mulf %16, %15 : vector<16x128xf32>
    %18 = arith.truncf %17 : vector<16x128xf32> to vector<16x128xbf16>
    %c0_10 = arith.constant 0 : index
    %c0_11 = arith.constant 0 : index
    %19 = vector.load %arg4[%c0_10, %c0_11] : memref<16x128xbf16, #tpu.memory_space<vmem>>, vector<16x128xbf16>
    tpu.vector_store %arg4[%c0_10, %c0_11], %18 {strides = array<i32>} : memref<16x128xbf16, #tpu.memory_space<vmem>>, vector<16x128xbf16>,
    return
  }
  func.func @transform_0(%arg0: i32) -> (i32, i32) {
    %c0_i32 = arith.constant 0 : i32
    %c0_i32_0 = arith.constant 0 : i32
    %c0_i32_1 = arith.constant 0 : i32
    return %c0_i32, %c0_i32_0 : i32, i32
  }
  func.func @transform_1(%arg0: i32) -> (i32, i32) {
    %c0_i32 = arith.constant 0 : i32
    %c0_i32_0 = arith.constant 0 : i32
    return %c0_i32, %arg0 : i32, i32
  }
  func.func @transform_2(%arg0: i32) -> (i32, i32) {
    %c0_i32 = arith.constant 0 : i32
    %c0_i32_0 = arith.constant 0 : i32
    %c0_i32_1 = arith.constant 0 : i32
    return %c0_i32, %c0_i32_0 : i32, i32
  }
  func.func @transform_3(%arg0: i32) -> (i32, i32) {
    %c0_i32 = arith.constant 0 : i32
    %c0_i32_0 = arith.constant 0 : i32
    return %c0_i32, %arg0 : i32, i32
  }
}

module attributes {stable_mosaic.version = 11 : i64} {
  func.func @_gemm_kernel(%arg0: i32, %arg1: memref<8x16xbf16, #tpu.memory_space<vmem>>, %arg2: memref<16x384xbf16, #tpu.memory_space<vmem>>, %arg3: memref<8x1xf32, #tpu.memory_space<vmem>>, %arg4: memref<8x384xbf16, #tpu.memory_space<vmem>>) attributes {dimension_semantics = [#tpu.dimension_semantics<parallel>], iteration_bounds = array<i64: 1>, scalar_prefetch = 0 : i64, scratch_operands = 0 : i64, tpu.core_type = #tpu.core_type<tc>, window_params = [{pipeline_mode = #tpu.pipeline_mode<synchronous>, transform_indices = @transform_0, window_bounds = array<i64: 8, 16>}, {transform_indices = @transform_1, window_bounds = array<i64: 16, 384>}, {pipeline_mode = #tpu.pipeline_mode<synchronous>, transform_indices = @transform_2, window_bounds = array<i64: 8, 1>}, {transform_indices = @transform_3, window_bounds = array<i64: 8, 384>}]} {
    %c0 = arith.constant 0 : index
    %c0_0 = arith.constant 0 : index
    %0 = vector.load %arg1[%c0, %c0_0] : memref<8x16xbf16, #tpu.memory_space<vmem>>, vector<8x16xbf16>
    %c0_1 = arith.constant 0 : index
    %c0_2 = arith.constant 0 : index
    %1 = vector.load %arg2[%c0_1, %c0_2] : memref<16x384xbf16, #tpu.memory_space<vmem>>, vector<16x384xbf16>
    %cst = arith.constant dense<0.000000e+00> : vector<8x384xf32>
    %2 = tpu.matmul %0, %1, %cst {dimension_numbers = #tpu.dot_dimension_numbers<[1], [0], [0], [1], [0, 0, 1, 1], [], []>} : vector<8x16xbf16>, vector<16x384xbf16>, vector<8x384xf32> -> vector<8x384xf32>
    %c0_3 = arith.constant 0 : index
    %c0_4 = arith.constant 0 : index
    %3 = vector.load %arg3[%c0_3, %c0_4] : memref<8x1xf32, #tpu.memory_space<vmem>>, vector<8x1xf32>
    %4 = vector.broadcast %3 : vector<8x1xf32> to vector<8x384xf32>
    %5 = arith.addf %2, %4 : vector<8x384xf32>
    %cst_5 = arith.constant 0.000000e+00 : f32
    %6 = vector.broadcast %cst_5 : f32 to vector<8x384xf32>
    %7 = arith.cmpf ogt, %5, %6 : vector<8x384xf32>
    %cst_6 = arith.constant 0.000000e+00 : f32
    %8 = vector.broadcast %cst_6 : f32 to vector<8x384xf32>
    %9 = arith.minimumf %5, %8 : vector<8x384xf32>
    %10 = math.exp %9 : vector<8x384xf32>
    %cst_7 = arith.constant 1.000000e+00 : f32
    %11 = vector.broadcast %cst_7 : f32 to vector<8x384xf32>
    %12 = arith.subf %10, %11 : vector<8x384xf32>
    %cst_8 = arith.constant 1.67326319 : f32
    %13 = vector.broadcast %cst_8 : f32 to vector<8x384xf32>
    %14 = arith.mulf %13, %12 : vector<8x384xf32>
    %15 = arith.select %7, %5, %14 : vector<8x384xi1>, vector<8x384xf32>
    %cst_9 = arith.constant 1.05070102 : f32
    %16 = vector.broadcast %cst_9 : f32 to vector<8x384xf32>
    %17 = arith.mulf %16, %15 : vector<8x384xf32>
    %18 = arith.truncf %17 : vector<8x384xf32> to vector<8x384xbf16>
    %c0_10 = arith.constant 0 : index
    %c0_11 = arith.constant 0 : index
    %19 = vector.load %arg4[%c0_10, %c0_11] : memref<8x384xbf16, #tpu.memory_space<vmem>>, vector<8x384xbf16>
    tpu.vector_store %arg4[%c0_10, %c0_11], %18 {strides = array<i32>} : memref<8x384xbf16, #tpu.memory_space<vmem>>, vector<8x384xbf16>,
    return
  }
  func.func @transform_0(%arg0: i32) -> (i32, i32) {
    %c0_i32 = arith.constant 0 : i32
    %c0_i32_0 = arith.constant 0 : i32
    %c0_i32_1 = arith.constant 0 : i32
    return %c0_i32, %c0_i32_0 : i32, i32
  }
  func.func @transform_1(%arg0: i32) -> (i32, i32) {
    %c0_i32 = arith.constant 0 : i32
    %c0_i32_0 = arith.constant 0 : i32
    return %c0_i32, %arg0 : i32, i32
  }
  func.func @transform_2(%arg0: i32) -> (i32, i32) {
    %c0_i32 = arith.constant 0 : i32
    %c0_i32_0 = arith.constant 0 : i32
    %c0_i32_1 = arith.constant 0 : i32
    return %c0_i32, %c0_i32_0 : i32, i32
  }
  func.func @transform_3(%arg0: i32) -> (i32, i32) {
    %c0_i32 = arith.constant 0 : i32
    %c0_i32_0 = arith.constant 0 : i32
    return %c0_i32, %arg0 : i32, i32
  }
}

module attributes {stable_mosaic.version = 11 : i64} {
  func.func @_gemm_kernel(%arg0: i32, %arg1: memref<12x8xbf16, #tpu.memory_space<vmem>>, %arg2: memref<8x1152xbf16, #tpu.memory_space<vmem>>, %arg3: memref<12x1xf32, #tpu.memory_space<vmem>>, %arg4: memref<12x1152xf32, #tpu.memory_space<vmem>>) attributes {dimension_semantics = [#tpu.dimension_semantics<parallel>], iteration_bounds = array<i64: 1>, scalar_prefetch = 0 : i64, scratch_operands = 0 : i64, tpu.core_type = #tpu.core_type<tc>, window_params = [{pipeline_mode = #tpu.pipeline_mode<synchronous>, transform_indices = @transform_0, window_bounds = array<i64: 12, 8>}, {transform_indices = @transform_1, window_bounds = array<i64: 8, 1152>}, {pipeline_mode = #tpu.pipeline_mode<synchronous>, transform_indices = @transform_2, window_bounds = array<i64: 12, 1>}, {transform_indices = @transform_3, window_bounds = array<i64: 12, 1152>}]} {
    %c0 = arith.constant 0 : index
    %c0_0 = arith.constant 0 : index
    %0 = vector.load %arg1[%c0, %c0_0] : memref<12x8xbf16, #tpu.memory_space<vmem>>, vector<12x8xbf16>
    %c0_1 = arith.constant 0 : index
    %c0_2 = arith.constant 0 : index
    %1 = vector.load %arg2[%c0_1, %c0_2] : memref<8x1152xbf16, #tpu.memory_space<vmem>>, vector<8x1152xbf16>
    %cst = arith.constant dense<0.000000e+00> : vector<12x1152xf32>
    %2 = tpu.matmul %0, %1, %cst {dimension_numbers = #tpu.dot_dimension_numbers<[1], [0], [0], [1], [0, 0, 1, 1], [], []>} : vector<12x8xbf16>, vector<8x1152xbf16>, vector<12x1152xf32> -> vector<12x1152xf32>
    %c0_3 = arith.constant 0 : index
    %c0_4 = arith.constant 0 : index
    %3 = vector.load %arg3[%c0_3, %c0_4] : memref<12x1xf32, #tpu.memory_space<vmem>>, vector<12x1xf32>
    %4 = vector.broadcast %3 : vector<12x1xf32> to vector<12x1152xf32>
    %5 = arith.addf %2, %4 : vector<12x1152xf32>
    %cst_5 = arith.constant 0.000000e+00 : f32
    %6 = vector.broadcast %cst_5 : f32 to vector<12x1152xf32>
    %7 = arith.subf %6, %5 : vector<12x1152xf32>
    %cst_6 = arith.constant 3.000000e+01 : f32
    %8 = vector.broadcast %cst_6 : f32 to vector<12x1152xf32>
    %9 = arith.minimumf %7, %8 : vector<12x1152xf32>
    %10 = math.exp %9 : vector<12x1152xf32>
    %cst_7 = arith.constant 1.000000e+00 : f32
    %11 = vector.broadcast %cst_7 : f32 to vector<12x1152xf32>
    %12 = arith.addf %11, %10 : vector<12x1152xf32>
    %13 = tpu.reciprocal %12 {approx = true} : vector<12x1152xf32> -> vector<12x1152xf32>
    %c0_8 = arith.constant 0 : index
    %c0_9 = arith.constant 0 : index
    %14 = vector.load %arg4[%c0_8, %c0_9] : memref<12x1152xf32, #tpu.memory_space<vmem>>, vector<12x1152xf32>
    tpu.vector_store %arg4[%c0_8, %c0_9], %13 {strides = array<i32>} : memref<12x1152xf32, #tpu.memory_space<vmem>>, vector<12x1152xf32>,
    return
  }
  func.func @transform_0(%arg0: i32) -> (i32, i32) {
    %c0_i32 = arith.constant 0 : i32
    %c0_i32_0 = arith.constant 0 : i32
    %c0_i32_1 = arith.constant 0 : i32
    return %c0_i32, %c0_i32_0 : i32, i32
  }
  func.func @transform_1(%arg0: i32) -> (i32, i32) {
    %c0_i32 = arith.constant 0 : i32
    %c0_i32_0 = arith.constant 0 : i32
    return %c0_i32, %arg0 : i32, i32
  }
  func.func @transform_2(%arg0: i32) -> (i32, i32) {
    %c0_i32 = arith.constant 0 : i32
    %c0_i32_0 = arith.constant 0 : i32
    %c0_i32_1 = arith.constant 0 : i32
    return %c0_i32, %c0_i32_0 : i32, i32
  }
  func.func @transform_3(%arg0: i32) -> (i32, i32) {
    %c0_i32 = arith.constant 0 : i32
    %c0_i32_0 = arith.constant 0 : i32
    return %c0_i32, %arg0 : i32, i32
  }
}

</mosaic_0001>

<bundles_post_ra>
// kernel: snconv2_vae_forward.9
= control target key start
LH: loop header
LB: loop body
LE: loop exit
PB: predicated region body
PF: predicated region fallthrough
CT: control target
= control target key end

     0   :  { %vm129_vm0 = vcmask 1044480   ;;  %vm130_vm1 = vcmask 1045504   ;;  %v623_v1 = vmov 65535   ;;  %v624_v3 = vmov 0   ;;  %s764_s1 = inlined_call_operand.vmem [shape: bf16[27,1152], index: 1, kind: input, shape index: {}]   ;;  %s765_s0 = inlined_call_operand.vmem [shape: bf16[2,27], index: 0, kind: input, shape index: {}]   ;;  %s766_s2 = inlined_call_operand.vmem [shape: f32[2,1], index: 2, kind: input, shape index: {}]   ;;  %s767_s3 = inlined_call_operand.vmem [shape: bf16[2,1152], index: 3, kind: output, shape index: {}]  }
   0x1   :  { %v579_v0 = vld [vmem:[%s764_s1 + $0x4] ss:$36 sps:$4 sm:$0xff]   ;;  %v131_v2 = vsel %vm129_vm0, 4294967295, %v623_v1  ;;  %192 = vmatprep.mubr.bf16.mxu0 %v624_v3  ;;  %233 = vmatprep.mubr.bf16.mxu1 %v624_v3  ;;  %v581_v4 = vld [vmem:[%s764_s1 + $0xc] ss:$36 sps:$4 sm:$0xff]   ;;  %vm125_vm2 = vcmask 220160  }
   0x2   :  { %578 = vset.pattern.permute.xlu0 %v624_v3  ;;  %160 = vmatprep.subr.bf16.mxu0 %v579_v0  ;;  %v583_v5 = vld [vmem:[%s764_s1] ss:$36 sps:$4 sm:$0xff]   ;;  %v584_v6 = vld [vmem:[%s764_s1 + $0x8] ss:$36 sps:$4 sm:$0xff]   ;;  %v132_v7 = vsel %vm130_vm1, %v131_v2, 0  ;;  %v625_v32 = vmov 0.0  }
   0x3   :  { %201 = vmatprep.subr.bf16.mxu1 %v581_v4  ;;  %v585_v8 = vld [vmem:[%s764_s1 + $0x4c] ss:$36 sps:$4 sm:$0x3f]   ;;  %161 = vmatpush1.bf16.msra.mxu0 %v583_v5  ;;  %v587_v9 = vld [vmem:[%s764_s1 + $0x54] ss:$36 sps:$4 sm:$0x3f]  }
   0x4   :  { %202 = vmatpush1.bf16.msra.mxu1 %v584_v6  ;;  %v137_v10 = vand.u32 %v585_v8, %v132_v7  ;;  %v589_v11 = vld [vmem:[%s764_s1 + $0x48] ss:$36 sps:$4 sm:$0x3f]   ;;  %v590_v12 = vld [vmem:[%s764_s1 + $0x50] ss:$36 sps:$4 sm:$0x3f]   ;;  %v143_v13 = vand.u32 %v587_v9, %v132_v7 }
   0x5   :  { %v134_v14 = vand.u32 %v589_v11, %v132_v7  ;;  %v140_v15 = vand.u32 %v590_v12, %v132_v7  ;;  %v15_v16 = vld [vmem:[%s765_s0] sm:$0x1]  ;;  %v591_v17 = vld [vmem:[%s764_s1 + $0x10] ss:$36 sps:$4 sm:$0xff]   ;;  %v594_v19 = vld [vmem:[%s764_s1 + $0x18] ss:$36 sps:$4 sm:$0xff]  }
   0x6   :  { %162 = vmatprep.subr.bf16.mxu0 %v137_v10  ;;  %v593_v18 = vld [vmem:[%s764_s1 + $0x14] ss:$36 sps:$4 sm:$0xff]   ;;  %203 = vmatprep.subr.bf16.mxu1 %v143_v13  ;;  %v596_v20 = vld [vmem:[%s764_s1 + $0x1c] ss:$36 sps:$4 sm:$0xff]   ;;  %vm626_vm3 = vmmov 0   ;;  %v461_v13 = vlaneseq }
   0x7   :  { %163 = vmatpush1.bf16.msra.mxu0 %v134_v14  ;;  %v597_v21 = vld [vmem:[%s764_s1 + $0x58] ss:$36 sps:$4 sm:$0x3f]   ;;  %v600_v23 = vld [vmem:[%s764_s1 + $0x60] ss:$36 sps:$4 sm:$0x3f]  }
   0x8   :  { %204 = vmatpush1.bf16.msra.mxu1 %v140_v15  ;;  %242 = vmatprep.subr.bf16.mxu0 %v593_v18  ;;  %v599_v22 = vld [vmem:[%s764_s1 + $0x5c] ss:$36 sps:$4 sm:$0x3f]   ;;  %v602_v24 = vld [vmem:[%s764_s1 + $0x64] ss:$36 sps:$4 sm:$0x3f]   ;;  %v146_v27 = vand.u32 %v597_v21, %v132_v7  ;;  %v152_v28 = vand.u32 %v600_v23, %v132_v7 }
   0x9   :  { %283 = vmatprep.subr.bf16.mxu1 %v596_v20  ;;  %v149_v25 = vand.u32 %v599_v22, %v132_v7  ;;  %v155_v26 = vand.u32 %v602_v24, %v132_v7  ;;  %v36_v29 = vld [vmem:[%s766_s2] sm:$0x3]  ;;  %v604_v31 = vld [vmem:[%s764_s1 + $0x68] ss:$36 sps:$4 sm:$0x3f]  }
   0xa   :  { %543 = vmatmul.mubr.msk.bf16.vlgmr.msra.gmra.mrb[0].mxu0 %vm125_vm2, %v15_v16  ;;  %39 = vperm.xlu0 %578, %v36_v29   ;;  %v603_v30 = vld [vmem:[%s764_s1 + $0x20] ss:$36 sps:$4 sm:$0xff]   ;;  %v158_v33 = vand.u32 %v604_v31, %v132_v7  ;;  %v627_v11 = vmov 1966171168   ;;  %v462_v29 = vshrl.u32 %v461_v13, 7 }
   0xb   :  { %544 = vmatmul.mubr.msk.bf16.vlgmr.msra.gmra.mrb[0].mxu1 %vm125_vm2, %v15_v16  ;;  %243 = vmatpush1.bf16.msra.mxu0 %v591_v17  ;;  %v459_v12 = vunpack.c.l.s4 %v627_v11 }
   0xc   :  { %284 = vmatpush1.bf16.msra.mxu1 %v594_v19  ;;  %244 = vmatprep.subr.bf16.mxu0 %v149_v25 }
   0xd   :  { %274 = vmatprep.mubr.bf16.mxu0 %v624_v3  ;;  %285 = vmatprep.subr.bf16.mxu1 %v155_v26 }
   0xe   :  { %315 = vmatprep.mubr.bf16.mxu1 %v624_v3 }
   0xf   :  { %245 = vmatpush1.bf16.msra.mxu0 %v146_v27 }
  0x10   :  { %286 = vmatpush1.bf16.msra.mxu1 %v152_v28  ;;  %565 = vmatprep.subr.bf16.mxu0 %v625_v32  ;;  %v460_v28 = vunpack.c.0.s8 %v459_v12 }
  0x12   :  { %545 = vmatmul.mubr.msk.bf16.vlgmr.msra.gmra.mrb[4].mxu0 %vm125_vm2, %v15_v16 }
  0x13   :  { %546 = vmatmul.mubr.msk.bf16.vlgmr.msra.gmra.mrb[4].mxu1 %vm125_vm2, %v15_v16  ;;  %566 = vmatpush3.bf16.msra.mxu0 %v603_v30 }
  0x14   :  { %569 = vmatprep.mubr.msk.bf16.mxu0 %vm626_vm3, %v625_v32  ;;  %567 = vmatprep.subr.bf16.mxu0 %v625_v32 }
  0x17   :  { %568 = vmatpush3.bf16.msra.mxu0 %v158_v33 }
  0x1a   :  { %570 = vmatmul.mubr.msk.bf16.vlgmr.msra.gmra.mrb[8].mxu0 %vm125_vm2, %v15_v16 }
  0x89   :  { %v40_v34 = vpop.permute.xlu0 %39 }
  0xdd   :  { %v194_v35 = vpop.f32.mrb[0].mxu0 }
  0xde   :  { %v235_v36 = vpop.f32.mrb[0].mxu1  ;;  %v713_v37 = vadd.f32 %v194_v35, %v40_v34  ;;  %v196_v39 = vpop.f32.mrb[1].mxu0 }
  0xdf   :  { %v715_v38 = vadd.f32 %v235_v36, %v40_v34  ;;  %v237_v40 = vpop.f32.mrb[1].mxu1  ;;  %v717_v41 = vadd.f32 %v196_v39, %v40_v34  ;;  %v198_v43 = vpop.f32.mrb[2].mxu0 }
  0xe0   :  { %v719_v42 = vadd.f32 %v237_v40, %v40_v34  ;;  %v239_v44 = vpop.f32.mrb[2].mxu1  ;;  %v373_v45 = vmin.f32 %v713_v37, 0.0  ;;  %v199_v47 = vpop.f32.mrb[3].mxu0  ;;  %vm364_vm4 = vcmp.gt.f32.partialorder %v713_v37, 0.0 }
  0xe1   :  { %v375_v46 = vmin.f32 %v715_v38, 0.0  ;;  %v240_v48 = vpop.f32.mrb[3].mxu1  ;;  %v374_v49 = vmin.f32 %v717_v41, 0.0  ;;  %vm366_vm5 = vcmp.gt.f32.partialorder %v715_v38, 0.0  ;;  %vm365_vm6 = vcmp.gt.f32.partialorder %v717_v41, 0.0 }
  0xe2   :  { %v376_v50 = vmin.f32 %v719_v42, 0.0  ;;  %v382_v51 = vmul.f32 1.442695, %v373_v45  ;;  %vm367_vm7 = vcmp.gt.f32.partialorder %v719_v42, 0.0 }
  0xe3   :  { %v386_v52 = vmul.f32 1.442695, %v375_v46  ;;  %v384_v53 = vmul.f32 1.442695, %v374_v49  ;;  %v463_v46 = vsub.s32 %v460_v28, %v462_v29 }
  0xe4   :  { %v388_v54 = vmul.f32 1.442695, %v376_v50  ;;  %605 = vpow2.f32 %v382_v51 }
  0xe5   :  { %607 = vpow2.f32 %v386_v52  ;;  %v276_v55 = vpop.f32.mrb[4].mxu0 }
  0xe6   :  { %v317_v56 = vpop.f32.mrb[4].mxu1  ;;  %609 = vpow2.f32 %v384_v53  ;;  %v725_v57 = vadd.f32 %v276_v55, %v40_v34  ;;  %v278_v59 = vpop.f32.mrb[5].mxu0 }
  0xe7   :  { %v727_v58 = vadd.f32 %v317_v56, %v40_v34  ;;  %v319_v60 = vpop.f32.mrb[5].mxu1  ;;  %611 = vpow2.f32 %v388_v54  ;;  %v729_v61 = vadd.f32 %v278_v59, %v40_v34  ;;  %v280_v63 = vpop.f32.mrb[6].mxu0 }
  0xe8   :  { %v731_v62 = vadd.f32 %v319_v60, %v40_v34  ;;  %v321_v0 = vpop.f32.mrb[6].mxu1  ;;  %v377_v1 = vmin.f32 %v725_v57, 0.0  ;;  %v281_v3 = vpop.f32.mrb[7].mxu0  ;;  %vm368_vm8 = vcmp.gt.f32.partialorder %v725_v57, 0.0 }
  0xe9   :  { %v379_v2 = vmin.f32 %v727_v58, 0.0  ;;  %v322_v4 = vpop.f32.mrb[7].mxu1  ;;  %v378_v5 = vmin.f32 %v729_v61, 0.0  ;;  %vm370_vm9 = vcmp.gt.f32.partialorder %v727_v58, 0.0  ;;  %vm369_vm10 = vcmp.gt.f32.partialorder %v729_v61, 0.0 }
  0xea   :  { %v380_v6 = vmin.f32 %v731_v62, 0.0  ;;  %v390_v7 = vmul.f32 1.442695, %v377_v1  ;;  %vm371_vm11 = vcmp.gt.f32.partialorder %v731_v62, 0.0 }
  0xeb   :  { %v394_v8 = vmul.f32 1.442695, %v379_v2  ;;  %v392_v9 = vmul.f32 1.442695, %v378_v5 }
  0xec   :  { %v396_v10 = vmul.f32 1.442695, %v380_v6  ;;  %613 = vpow2.f32 %v390_v7 }
  0xed   :  { %615 = vpow2.f32 %v394_v8  ;;  %v358_v14 = vpop.f32.mrb[8].mxu0 }
  0xee   :  { %v606_v15 = vpop.eup %605  ;;  %617 = vpow2.f32 %v392_v9  ;;  %v737_v16 = vadd.f32 %v358_v14, %v40_v34  ;;  %v571_v17 = vpop.f32.mrb[9].mxu0 }
  0xef   :  { %v608_v18 = vpop.eup %607  ;;  %v548_v19 = vadd.f32 -1.0, %v606_v15  ;;  %619 = vpow2.f32 %v396_v10  ;;  %v361_v20 = vpop.f32.mrb[10].mxu0 }
  0xf0   :  { %v610_v21 = vpop.eup %609  ;;  %v550_v22 = vadd.f32 -1.0, %v608_v18  ;;  %v381_v23 = vmin.f32 %v737_v16, 0.0  ;;  %v572_v24 = vpop.f32.mrb[11].mxu0  ;;  %vm372_vm12 = vcmp.gt.f32.partialorder %v737_v16, 0.0 }
  0xf1   :  { %v612_v25 = vpop.eup %611  ;;  %v409_v26 = vmul.f32 1.6732632, %v548_v19  ;;  %v549_v27 = vadd.f32 -1.0, %v610_v21 }
  0xf2   :  { %v411_v30 = vmul.f32 1.6732632, %v550_v22  ;;  %v551_v31 = vadd.f32 -1.0, %v612_v25  ;;  %v398_v32 = vmul.f32 1.442695, %v381_v23 }
  0xf3   :  { %v418_v33 = vsel %vm364_vm4, %v713_v37, %v409_v26  ;;  %v410_v34 = vmul.f32 1.6732632, %v549_v27 }
  0xf4   :  { %v427_v35 = vmul.f32 1.050701, %v418_v33  ;;  %v420_v36 = vsel %vm366_vm5, %v715_v38, %v411_v30  ;;  %v412_v39 = vmul.f32 1.6732632, %v551_v31  ;;  %621 = vpow2.f32 %v398_v32 }
  0xf5   :  { %v429_v40 = vmul.f32 1.050701, %v420_v36  ;;  %v419_v43 = vsel %vm365_vm6, %v717_v41, %v410_v34 }
  0xf6   :  { %v614_v44 = vpop.eup %613  ;;  %v428_v45 = vmul.f32 1.050701, %v419_v43  ;;  %v421_v37 = vsel %vm367_vm7, %v719_v42, %v412_v39 }
  0xf7   :  { %v616_v47 = vpop.eup %615  ;;  %v430_v48 = vmul.f32 1.050701, %v421_v37  ;;  %v552_v49 = vadd.f32 -1.0, %v614_v44 }
  0xf8   :  { %v618_v50 = vpop.eup %617  ;;  %v557_v51 = vpack.c.bf16 %v428_v45, %v427_v35  ;;  %v554_v52 = vadd.f32 -1.0, %v616_v47 }
  0xf9   :  { %v620_v53 = vpop.eup %619  ;;  %v558_v38 = vpack.c.bf16 %v430_v48, %v429_v40  ;;  %v413_v54 = vmul.f32 1.6732632, %v552_v49  ;;  %v553_v55 = vadd.f32 -1.0, %v618_v50 }
  0xfa   :  { %v464_v56 = vrot.slane %v557_v51, %v463_v46  ;;  %v415_v41 = vmul.f32 1.6732632, %v554_v52  ;;  %v555_v59 = vadd.f32 -1.0, %v620_v53 }
  0xfb   :  { %v471_v60 = vrot.slane %v558_v38, %v463_v46  ;;  %v422_v63 = vsel %vm368_vm8, %v725_v57, %v413_v54  ;;  %v414_v42 = vmul.f32 1.6732632, %v553_v55 }
  0xfc   :  { %v431_v0 = vmul.f32 1.050701, %v422_v63  ;;  %v424_v1 = vsel %vm370_vm9, %v727_v58, %v415_v41  ;;  %v416_v2 = vmul.f32 1.6732632, %v555_v59 }
  0xfd   :  { %v486_v3 = vcombine.low %v464_v56, %v471_v60  ;;  %v433_v4 = vmul.f32 1.050701, %v424_v1  ;;  %v423_v5 = vsel %vm369_vm10, %v729_v61, %v414_v42 }
  0xfe   :  { %v622_v6 = vpop.eup %621  ;;  %v432_v7 = vmul.f32 1.050701, %v423_v5  ;;  %v425_v8 = vsel %vm371_vm11, %v731_v62, %v416_v2 }
  0xff   :  { %v434_v57 = vmul.f32 1.050701, %v425_v8  ;;  %v556_v9 = vadd.f32 -1.0, %v622_v6  ;;  %v494_v18 = vrot.slane %v486_v3, %v463_v46 }
 0x100   :  { %v559_v10 = vpack.c.bf16 %v432_v7, %v431_v0 }
 0x101   :  { %v560_v11 = vpack.c.bf16 %v434_v57, %v433_v4  ;;  %v417_v12 = vmul.f32 1.6732632, %v556_v9 }
 0x102   :  { %v478_v13 = vrot.slane %v559_v10, %v463_v46 }
 0x103   :  { %v485_v58 = vrot.slane %v560_v11, %v463_v46  ;;  %v426_v14 = vsel %vm372_vm12, %v737_v16, %v417_v12 }
 0x104   :  { %v435_v15 = vmul.f32 1.050701, %v426_v14 }
 0x105   :  { %v487_v17 = vcombine.low %v478_v13, %v485_v58 }
 0x106   :  { %v444_v61 = vpack.c.bf16 %v435_v15, %v435_v15 }
 0x107   :  { %v501_v19 = vrot.slane %v487_v17, %v463_v46 }
 0x108   :  { %v509_v20 = vrot.slane %v444_v61, %v463_v46 }
 0x109   :  { %v502_v21 = vcombine.low %v494_v18, %v501_v19 }
 0x10a   :  { %561 = vst.sshfl [vmem:[%s767_s3 + $0x8] sm:$0x1 pattern:$0x73625140] %v509_v20 }
 0x10b   :  { %519 = vst [vmem:[%s767_s3] sm:$0xff] %v502_v21 }

// kernel: snconv2_vae_forward.10
= control target key start
LH: loop header
LB: loop body
LE: loop exit
PB: predicated region body
PF: predicated region fallthrough
CT: control target
= control target key end

     0   :  { %v147_v1 = vmov 0   ;;  %vm44_vm0 = vcmask 1040384   ;;  %vm40_vm1 = vcmask 146432   ;;  %s186_s1 = inlined_call_operand.vmem [shape: bf16[18,256], index: 1, kind: input, shape index: {}]   ;;  %s187_s2 = inlined_call_operand.vmem [shape: f32[4,1], index: 2, kind: input, shape index: {}]   ;;  %s188_s0 = inlined_call_operand.vmem [shape: bf16[4,18], index: 0, kind: input, shape index: {}]   ;;  %s189_s3 = inlined_call_operand.vmem [shape: bf16[4,256], index: 3, kind: output, shape index: {}]  }
   0x1   :  { %v18_v0 = vld [vmem:[%s186_s1 + $0x10] sm:$0x11]  ;;  %83 = vmatprep.mubr.bf16.mxu0 %v147_v1  ;;  %137 = vset.pattern.permute.xlu0 %v147_v1  ;;  %v138_v2 = vld [vmem:[%s186_s1 + $0x4] ss:$8 sps:$4 sm:$0xff]   ;;  %v141_v4 = vld [vmem:[%s186_s1] ss:$8 sps:$4 sm:$0xff]  }
   0x2   :  { %v129_v3 = vcombine.high %v18_v0, %v18_v0  ;;  %v128_v5 = vcombine.low %v18_v0, %v18_v0  ;;  %v19_v6 = vld [vmem:[%s187_s2] sm:$0xf]  ;;  %51 = vmatprep.subr.bf16.mxu0 %v138_v2 }
   0x3   :  { %22 = vperm.xlu0 %137, %v19_v6   ;;  %52 = vmatpush1.bf16.msra.mxu0 %v141_v4  ;;  %v15_v8 = vld [vmem:[%s188_s0] sm:$0x3] }
   0x4   :  { %130 = vmatprep.subr.msk.bf16.mxu0 %vm44_vm0, %v129_v3  ;;  %v46_v7 = vsel %vm44_vm0, %v128_v5, 0 }
   0x7   :  { %54 = vmatpush1.bf16.msra.mxu0 %v46_v7 }
   0xa   :  { %131 = vmatmul.mubr.msk.bf16.vlgmr.msra.gmra.mrb[0].mxu0 %vm40_vm1, %v15_v8 }
  0x82   :  { %v23_v9 = vpop.permute.xlu0 %22 }
  0xdd   :  { %v85_v10 = vpop.f32.mrb[0].mxu0 }
  0xde   :  { %v86_v11 = vadd.f32 %v85_v10, %v23_v9  ;;  %v87_v12 = vpop.f32.mrb[1].mxu0 }
  0xdf   :  { %v88_v13 = vadd.f32 %v87_v12, %v23_v9  ;;  %v89_v14 = vpop.f32.mrb[2].mxu0 }
  0xe0   :  { %v94_v15 = vmin.f32 %v86_v11, 0.0  ;;  %v90_v16 = vpop.f32.mrb[3].mxu0  ;;  %vm92_vm2 = vcmp.gt.f32.partialorder %v86_v11, 0.0 }
  0xe1   :  { %v95_v17 = vmin.f32 %v88_v13, 0.0  ;;  %vm93_vm3 = vcmp.gt.f32.partialorder %v88_v13, 0.0 }
  0xe2   :  { %v96_v18 = vmul.f32 1.442695, %v94_v15 }
  0xe3   :  { %v98_v19 = vmul.f32 1.442695, %v95_v17 }
  0xe4   :  { %143 = vpow2.f32 %v96_v18 }
  0xe5   :  { %145 = vpow2.f32 %v98_v19 }
  0xee   :  { %v144_v20 = vpop.eup %143 }
  0xef   :  { %v146_v21 = vpop.eup %145  ;;  %v132_v22 = vadd.f32 -1.0, %v144_v20 }
  0xf0   :  { %v133_v23 = vadd.f32 -1.0, %v146_v21 }
  0xf1   :  { %v102_v24 = vmul.f32 1.6732632, %v132_v22 }
  0xf2   :  { %v103_v25 = vmul.f32 1.6732632, %v133_v23 }
  0xf3   :  { %v104_v26 = vsel %vm92_vm2, %v86_v11, %v102_v24 }
  0xf4   :  { %v106_v27 = vmul.f32 1.050701, %v104_v26  ;;  %v105_v28 = vsel %vm93_vm3, %v88_v13, %v103_v25 }
  0xf5   :  { %v107_v29 = vmul.f32 1.050701, %v105_v28 }
  0xf7   :  { %v134_v30 = vpack.c.bf16 %v107_v29, %v106_v27 }
  0xf9   :  { %135 = vst.sshfl [vmem:[%s189_s3] sm:$0x33 pattern:$0x76325410] %v134_v30 }

// kernel: snconv2_vae_forward.11
= control target key start
LH: loop header
LB: loop body
LE: loop exit
PB: predicated region body
PF: predicated region fallthrough
CT: control target
= control target key end

     0   :  { %v132_v0 = vmov 0.0   ;;  %vm133_vm0 = vmmov 0   ;;  %v134_v2 = vmov 0   ;;  %vm46_vm1 = vcmask 1041408   ;;  %s173_s1 = inlined_call_operand.vmem [shape: bf16[36,128], index: 1, kind: input, shape index: {}]   ;;  %s174_s2 = inlined_call_operand.vmem [shape: f32[8,1], index: 2, kind: input, shape index: {}]   ;;  %s175_s0 = inlined_call_operand.vmem [shape: bf16[8,36], index: 0, kind: input, shape index: {}]   ;;  %s176_s3 = inlined_call_operand.vmem [shape: bf16[8,128], index: 3, kind: output, shape index: {}]  }
   0x1   :  { %113 = vmatprep.subr.bf16.mxu0 %v132_v0  ;;  %v127_v1 = vld [vmem:[%s173_s1] sm:$0xff]   ;;  %119 = vmatprep.mubr.msk.bf16.mxu0 %vm133_vm0, %v132_v0  ;;  %v128_v3 = vld [vmem:[%s173_s1 + $0x8] sm:$0xff]   ;;  %v129_v5 = vld [vmem:[%s173_s1 + $0x10] ss:$0 sps:$4 sm:$0x33]   ;;  %vm42_vm2 = vcmask 293888  }
   0x2   :  { %126 = vset.pattern.permute.xlu0 %v134_v2  ;;  %114 = vmatpush3.bf16.msra.mxu0 %v127_v1  ;;  %v21_v4 = vld [vmem:[%s174_s2] sm:$0xff]  ;;  %v48_v6 = vsel %vm46_vm1, %v129_v5, 0 }
   0x3   :  { %115 = vmatprep.subr.bf16.mxu0 %v132_v0  ;;  %24 = vperm.xlu0 %126, %v21_v4   ;;  %v15_v7 = vld [vmem:[%s175_s0] sm:$0xf] }
   0x6   :  { %116 = vmatpush3.bf16.msra.mxu0 %v128_v3 }
   0x7   :  { %117 = vmatprep.subr.bf16.mxu0 %v132_v0 }
   0xa   :  { %118 = vmatpush3.bf16.msra.mxu0 %v48_v6 }
   0xd   :  { %120 = vmatmul.mubr.msk.bf16.vlgmr.msra.gmra.mrb[0].mxu0 %vm42_vm2, %v15_v7 }
  0x82   :  { %v25_v8 = vpop.permute.xlu0 %24 }
  0xe0   :  { %v84_v9 = vpop.f32.mrb[0].mxu0 }
  0xe1   :  { %v85_v10 = vadd.f32 %v84_v9, %v25_v8  ;;  %v121_v11 = vpop.f32.mrb[1].mxu0 }
  0xe2   :  { %v87_v12 = vpop.f32.mrb[2].mxu0 }
  0xe3   :  { %v91_v13 = vmin.f32 %v85_v10, 0.0  ;;  %v122_v14 = vpop.f32.mrb[3].mxu0  ;;  %vm90_vm3 = vcmp.gt.f32.partialorder %v85_v10, 0.0 }
  0xe5   :  { %v92_v15 = vmul.f32 1.442695, %v91_v13 }
  0xe7   :  { %130 = vpow2.f32 %v92_v15 }
  0xf1   :  { %v131_v16 = vpop.eup %130 }
  0xf2   :  { %v108_v17 = vadd.f32 -1.0, %v131_v16 }
  0xf4   :  { %v95_v18 = vmul.f32 1.6732632, %v108_v17 }
  0xf6   :  { %v96_v19 = vsel %vm90_vm3, %v85_v10, %v95_v18 }
  0xf7   :  { %v97_v20 = vmul.f32 1.050701, %v96_v19 }
  0xf9   :  { %v98_v21 = vpack.c.bf16 %v97_v20, %v97_v20 }
  0xfb   :  { %99 = vst [vmem:[%s176_s3] sm:$0xf] %v98_v21 }

// kernel: snconv2_vae_forward.12
= control target key start
LH: loop header
LB: loop body
LE: loop exit
PB: predicated region body
PF: predicated region fallthrough
CT: control target
= control target key end

     0   :  { %v201_v0 = vmov 0.0   ;;  %vm202_vm0 = vmmov 0   ;;  %v203_v2 = vmov 0   ;;  %vm74_vm1 = vcmask 1043456   ;;  %s251_s1 = inlined_call_operand.vmem [shape: bf16[72,128], index: 1, kind: input, shape index: {}]   ;;  %s252_s2 = inlined_call_operand.vmem [shape: f32[16,1], index: 2, kind: input, shape index: {}]   ;;  %s253_s0 = inlined_call_operand.vmem [shape: bf16[16,72], index: 0, kind: input, shape index: {}]   ;;  %s254_s3 = inlined_call_operand.vmem [shape: bf16[16,128], index: 3, kind: output, shape index: {}]  }
   0x1   :  { %173 = vmatprep.subr.bf16.mxu0 %v201_v0  ;;  %v191_v1 = vld [vmem:[%s251_s1] sm:$0xff]   ;;  %183 = vmatprep.mubr.msk.bf16.mxu0 %vm202_vm0, %v201_v0  ;;  %v192_v3 = vld [vmem:[%s251_s1 + $0x8] sm:$0xff]   ;;  %v193_v5 = vld [vmem:[%s251_s1 + $0x10] sm:$0xff]   ;;  %vm70_vm2 = vcmask 588800  }
   0x2   :  { %190 = vset.pattern.permute.xlu0 %v203_v2  ;;  %174 = vmatpush3.bf16.msra.mxu0 %v191_v1  ;;  %v26_v4 = vld [vmem:[%s252_s2] sm:$0xff]  ;;  %v27_v6 = vld [vmem:[%s252_s2 + $0x8] sm:$0xff]  ;;  %v194_v7 = vld [vmem:[%s251_s1 + $0x18] sm:$0xff]  }
   0x3   :  { %175 = vmatprep.subr.bf16.mxu0 %v201_v0  ;;  %30 = vperm.xlu0 %190, %v26_v4   ;;  %v195_v8 = vld [vmem:[%s251_s1 + $0x20] ss:$0 sps:$4 sm:$0xff]  }
   0x4   :  { %v76_v9 = vsel %vm74_vm1, %v195_v8, 0  ;;  %v196_v10 = vld [vmem:[%s253_s0] sm:$0xff]  }
   0x6   :  { %176 = vmatpush3.bf16.msra.mxu0 %v192_v3 }
   0x7   :  { %177 = vmatprep.subr.bf16.mxu0 %v201_v0  ;;  %35 = vperm.xlu0 %190, %v27_v6  }
   0xa   :  { %178 = vmatpush3.bf16.msra.mxu0 %v193_v5 }
   0xb   :  { %179 = vmatprep.subr.bf16.mxu0 %v201_v0 }
   0xe   :  { %180 = vmatpush3.bf16.msra.mxu0 %v194_v7 }
   0xf   :  { %181 = vmatprep.subr.bf16.mxu0 %v201_v0 }
  0x12   :  { %182 = vmatpush3.bf16.msra.mxu0 %v76_v9 }
  0x15   :  { %184 = vmatmul.mubr.msk.bf16.vlgmr.msra.gmra.mrb[0].mxu0 %vm70_vm2, %v196_v10 }
  0x82   :  { %v31_v11 = vpop.permute.xlu0 %30 }
  0x86   :  { %v36_v15 = vpop.permute.xlu0 %35 }
  0xe8   :  { %v112_v12 = vpop.f32.mrb[0].mxu0 }
  0xe9   :  { %v113_v13 = vadd.f32 %v112_v12, %v31_v11  ;;  %v185_v14 = vpop.f32.mrb[1].mxu0 }
  0xea   :  { %v115_v16 = vpop.f32.mrb[2].mxu0 }
  0xeb   :  { %v121_v17 = vmin.f32 %v113_v13, 0.0  ;;  %v116_v18 = vadd.f32 %v115_v16, %v36_v15  ;;  %v186_v19 = vpop.f32.mrb[3].mxu0  ;;  %vm119_vm3 = vcmp.gt.f32.partialorder %v113_v13, 0.0 }
  0xed   :  { %v123_v20 = vmul.f32 1.442695, %v121_v17  ;;  %v122_v21 = vmin.f32 %v116_v18, 0.0  ;;  %vm120_vm4 = vcmp.gt.f32.partialorder %v116_v18, 0.0 }
  0xef   :  { %197 = vpow2.f32 %v123_v20  ;;  %v125_v22 = vmul.f32 1.442695, %v122_v21 }
  0xf1   :  { %199 = vpow2.f32 %v125_v22 }
  0xf9   :  { %v198_v23 = vpop.eup %197 }
  0xfa   :  { %v156_v24 = vadd.f32 -1.0, %v198_v23 }
  0xfb   :  { %v200_v25 = vpop.eup %199 }
  0xfc   :  { %v129_v26 = vmul.f32 1.6732632, %v156_v24  ;;  %v157_v27 = vadd.f32 -1.0, %v200_v25 }
  0xfe   :  { %v131_v28 = vsel %vm119_vm3, %v113_v13, %v129_v26  ;;  %v130_v29 = vmul.f32 1.6732632, %v157_v27 }
  0xff   :  { %v133_v31 = vmul.f32 1.050701, %v131_v28 }
 0x100   :  { %v132_v30 = vsel %vm120_vm4, %v116_v18, %v130_v29 }
 0x101   :  { %v134_v32 = vmul.f32 1.050701, %v132_v30 }
 0x103   :  { %v165_v33 = vpack.c.bf16 %v134_v32, %v133_v31 }
 0x105   :  { %166 = vst [vmem:[%s254_s3] sm:$0xff] %v165_v33  }

// kernel: snconv2_vae_forward.13
= control target key start
LH: loop header
LB: loop body
LE: loop exit
PB: predicated region body
PF: predicated region fallthrough
CT: control target
= control target key end

     0   :  { %16 = vsyncpa [#allocation3], 0  ;;  %v493_v3 = vmov 0.0|0.0   ;;  %vm494_vm0 = vmmov 0   ;;  %v495_v6 = vmov 0.0   ;;  %s649_s0 = inlined_call_operand.vmem [shape: f32[2,64], index: 0, kind: input, shape index: {}]   ;;  %s650_s1 = inlined_call_operand.vmem [shape: f32[64,8], index: 1, kind: input, shape index: {}]   ;;  %s651_s2 = inlined_call_operand.vmem [shape: f32[1,8], index: 2, kind: input, shape index: {}]   ;;  %s652_s3 = inlined_call_operand.vmem [shape: f32[64,8], index: 3, kind: input, shape index: {}]   ;;  %s653_s4 = inlined_call_operand.vmem [shape: f32[1,8], index: 4, kind: input, shape index: {}]   ;;  %s654_s5 = inlined_call_operand.vmem [shape: f32[2,8], index: 5, kind: input, shape index: {}]   ;;  %s655_s6 = inlined_call_operand.vmem [shape: f32[8,64], index: 6, kind: input, shape index: {}]   ;;  %s656_s7 = inlined_call_operand.vmem [shape: f32[1,64], index: 7, kind: input, shape index: {}]   ;;  %s657_s8 = inlined_call_operand.hbm [shape: f32[2,8], index: 8, kind: output, shape index: {0}]   ;;  %s658_s9 = inlined_call_operand.hbm [shape: f32[2,8], index: 9, kind: output, shape index: {1}]   ;;  %s659_s10 = inlined_call_operand.vmem [shape: f32[2,64], index: 10, kind: output, shape index: {2}]  }
   0x1   :  { %v124_v0 = vld [vmem:[%s652_s3] sm:$0xff]  ;;  %v125_v1 = vld [vmem:[%s652_s3 + $0x8] sm:$0xff]  ;;  %v126_v2 = vld [vmem:[%s652_s3 + $0x10] sm:$0xff]  ;;  %424 = vmatprep.subr.bf16.mxu1 %v493_v3  ;;  %404 = vmatprep.mubr.msk.f32.mxu1 %vm494_vm0, %v495_v6 }
   0x2   :  { %v425_v4 = vpack.c.bf16 %v125_v1, %v124_v0  ;;  %v127_v5 = vld [vmem:[%s652_s3 + $0x18] sm:$0xff]  ;;  %412 = vmatprep.subr.bf16.mxu0 %v493_v3  ;;  %385 = vmatprep.mubr.msk.f32.mxu0 %vm494_vm0, %v495_v6  ;;  %v35_v8 = vld [vmem:[%s650_s1] sm:$0xff]  ;;  %v36_v9 = vld [vmem:[%s650_s1 + $0x8] sm:$0xff] }
   0x3   :  { %v428_v7 = vpack.c.bf16 %v127_v5, %v126_v2  ;;  %v37_v10 = vld [vmem:[%s650_s1 + $0x10] sm:$0xff]  ;;  %v128_v11 = vld [vmem:[%s652_s3 + $0x20] sm:$0xff]  ;;  %v129_v12 = vld [vmem:[%s652_s3 + $0x28] sm:$0xff]  ;;  %v413_v13 = vpack.c.bf16 %v36_v9, %v35_v8 }
   0x4   :  { %426 = vmatpush3.bf16.msra.mxu1 %v425_v4  ;;  %v38_v14 = vld [vmem:[%s650_s1 + $0x18] sm:$0xff] }
   0x5   :  { %427 = vmatprep.subr.bf16.mxu1 %v493_v3  ;;  %414 = vmatpush3.bf16.msra.mxu0 %v413_v13  ;;  %v416_v15 = vpack.c.bf16 %v38_v14, %v37_v10 }
   0x6   :  { %17 = vsyncpa [#allocation5], 0  ;;  %v431_v16 = vpack.c.bf16 %v129_v12, %v128_v11  ;;  %415 = vmatprep.subr.bf16.mxu0 %v493_v3  ;;  %v39_v17 = vld [vmem:[%s650_s1 + $0x20] sm:$0xff]  ;;  %v40_v18 = vld [vmem:[%s650_s1 + $0x28] sm:$0xff]  ;;  %vm50_vm1 = vcmask 523264   ;;  %vm297_vm2 = vcmask 58368  }
   0x7   :  { %v130_v19 = vld [vmem:[%s652_s3 + $0x30] sm:$0xff]  ;;  %v131_v20 = vld [vmem:[%s652_s3 + $0x38] sm:$0xff]  ;;  %v419_v21 = vpack.c.bf16 %v40_v18, %v39_v17  ;;  %v34_v26 = vld [vmem:[%s649_s0] sm:$0x3]  ;;  %vm223_vm3 = vcmask 64512  }
   0x8   :  { %429 = vmatpush3.bf16.msra.mxu1 %v428_v7  ;;  %v434_v22 = vpack.c.bf16 %v131_v20, %v130_v19  ;;  %v41_v23 = vld [vmem:[%s650_s1 + $0x30] sm:$0xff]  ;;  %v42_v24 = vld [vmem:[%s650_s1 + $0x38] sm:$0xff]  ;;  %v215_v27 = vld [vmem:[%s655_s6] sm:$0xff] }
   0x9   :  { %430 = vmatprep.subr.bf16.mxu1 %v493_v3  ;;  %417 = vmatpush3.bf16.msra.mxu0 %v416_v15  ;;  %v422_v25 = vpack.c.bf16 %v42_v24, %v41_v23  ;;  %v344_v28 = vld [vmem:[%s653_s4] ss:$0 sm:$0xff]  ;;  %s496_s4 = smov [#allocation2]  }
   0xa   :  { %418 = vmatprep.subr.bf16.mxu0 %v493_v3  ;;  %v342_v32 = vld [vmem:[%s651_s2] ss:$0 sm:$0xff]  ;;  %s316_s11 = sshll.u32 %s496_s4, 4  ;;  %s497_s2 = smov [#allocation4]   ;;  %s317_s11 = int_to_ptr.vmem [resolvable:$true] %s316_s11 }
   0xb   :  { %v212_v38 = vld [vmem:[%s654_s5] sm:$0x3]  ;;  %s326_s12 = sshll.u32 %s497_s2, 4  ;;  %s445_s13 = scalar_lea.vmem %s317_s11, 32  ;;  %s327_s12 = int_to_ptr.vmem [resolvable:$true] %s326_s12 }
   0xc   :  { %432 = vmatpush3.bf16.msra.mxu1 %v431_v16  ;;  %p446_p0 = scmp.ne.s32.totalorder %s317_s11, %s445_s13  ;;  %p450_p1 = scmp.lt.s32.totalorder %s317_s11, %s317_s11 }
   0xd   :  { %433 = vmatprep.subr.bf16.mxu1 %v493_v3  ;;  %420 = vmatpush3.bf16.msra.mxu0 %v419_v21  ;;  %p451_p2 = scmp.lt.s32.totalorder %s445_s13, %s445_s13 }
   0xe   :  { %421 = vmatprep.subr.bf16.mxu0 %v493_v3 }
   0xf   :  { %p452_p3 = por %p451_p2, %p450_p1 }
  0x10   :  { %435 = vmatpush3.bf16.msra.mxu1 %v434_v22 }
  0x11   :  { %423 = vmatpush3.bf16.msra.mxu0 %v422_v25  ;;  %p453_p4 = pnand %p452_p3, %p446_p0 }
  0x12   :  { %407 = vmatprep.subr.mxu0 %v495_v6 }
  0x13   :  { %405 = vmatmul.mubr.msk.f32.vlgmr.msra.gmra.mrb[0].mxu1 %vm50_vm1, %v34_v26 }
  0x14   :  { %386 = vmatmul.mubr.msk.f32.vlgmr.msra.gmra.mrb[0].mxu0 %vm50_vm1, %v34_v26 }
  0x15   :  { %409 = vmatprep.mubr.msk.f32.mxu0 %vm494_vm0, %v495_v6  ;;  %408 = vmatpush3.msra.mxu0 %v215_v27 }
  0xe6   :  { %v205_v29 = vpop.f32.mrb[0].mxu1 }
  0xe7   :  { %v206_v30 = vadd.f32 %v344_v28, %v205_v29  ;;  %v406_v31 = vpop.f32.mrb[1].mxu1  ;;  %v120_v34 = vpop.f32.mrb[0].mxu0 }
  0xe8   :  { %v121_v35 = vadd.f32 %v342_v32, %v120_v34  ;;  %v387_v36 = vpop.f32.mrb[1].mxu0 }
  0xe9   :  { %v209_v33 = vmul.f32 0.5, %v206_v30  ;;  %299 = vst.msk [vmem:[#allocation4] sm:$0x3] %vm297_vm2, %v206_v30 }
  0xea   :  { %298 = vst.msk [vmem:[#allocation2] sm:$0x3] %vm297_vm2, %v121_v35 }
  0xeb   :  { %v210_v37 = vmul.f32 1.442695, %v209_v33 }
  0xed   :  { %441 = vpow2.f32 %v210_v37 }
  0xf7   :  { %v442_v39 = vpop.eup %441 }
  0xf8   :  { %v213_v40 = vmul.f32 %v442_v39, %v212_v38 }
  0xfa   :  { %v214_v41 = vadd.f32 %v213_v40, %v121_v35 }
  0xfc   :  { %410 = vmatmul.mubr.msk.f32.vlgmr.msra.gmra.mrb[2].mxu0 %vm223_vm3, %v214_v41 }
  0xfd   :  { %456 = shalt.err (!%p453_p4)
}
  0xfe   :  { %s457_s15 = scalar_lea.hbm %s657_s8, 32 }
  0xff   :  { %p458_p5 = scmp.ne.s32.totalorder %s657_s8, %s457_s15  ;;  %p461_p6 = scmp.lt.u32.totalorder %s457_s15, %s657_s8 }
 0x101   :  { %p463_p7 = pnand %p461_p6, %p458_p5 }
 0x103   :  { %466 = shalt.err (!%p463_p7)
}
 0x104   :  { %319 = dma.vmem_to_hbm [thread:$0]  %s317_s11, 32, %s657_s8, [#allocation3]  }
 0x105   :  { %s467_s22 = scalar_lea.vmem %s327_s12, 32  ;;  %p472_p9 = scmp.lt.s32.totalorder %s327_s12, %s327_s12 }
 0x106   :  { %p468_p8 = scmp.ne.s32.totalorder %s327_s12, %s467_s22  ;;  %p473_p10 = scmp.lt.s32.totalorder %s467_s22, %s467_s22 }
 0x108   :  { %p474_p11 = por %p473_p10, %p472_p9 }
 0x10a   :  { %p475_p12 = pnand %p474_p11, %p468_p8 }
 0x10c   :  { %478 = shalt.err (!%p475_p12)
}
 0x10d   :  { %s479_s25 = scalar_lea.hbm %s658_s9, 32 }
 0x10e   :  { %p480_p13 = scmp.ne.s32.totalorder %s658_s9, %s479_s25  ;;  %p483_p0 = scmp.lt.u32.totalorder %s479_s25, %s658_s9 }
 0x110   :  { %p485_p1 = pnand %p483_p0, %p480_p13 }
 0x112   :  { %488 = shalt.err (!%p485_p1)
}
 0x113   :  { %329 = dma.vmem_to_hbm [thread:$0]  %s327_s12, 32, %s658_s9, [#allocation5]   ;;  %v346_v42 = vld [vmem:[%s656_s7] ss:$0 sm:$0xff]  ;;  %vm308_vm5 = vcmask 517120  }
 0x1cf   :  { %v293_v43 = vpop.f32.mrb[2].mxu0 }
 0x1d0   :  { %v294_v44 = vadd.f32 %v346_v42, %v293_v43  ;;  %v411_v45 = vpop.f32.mrb[3].mxu0 }
 0x1d2   :  { %v301_v46 = vmin.f32 %v294_v44, 0.0  ;;  %vm300_vm4 = vcmp.gt.f32.partialorder %v294_v44, 0.0 }
 0x1d4   :  { %v302_v47 = vmul.f32 1.442695, %v301_v46 }
 0x1d6   :  { %443 = vpow2.f32 %v302_v47 }
 0x1e0   :  { %v444_v48 = vpop.eup %443 }
 0x1e1   :  { %v348_v49 = vadd.f32 -1.0, %v444_v48 }
 0x1e3   :  { %v305_v50 = vmul.f32 1.6732632, %v348_v49 }
 0x1e5   :  { %v306_v51 = vsel %vm300_vm4, %v294_v44, %v305_v50 }
 0x1e6   :  { %v307_v52 = vmul.f32 1.050701, %v306_v51 }
 0x1e8   :  { %309 = vst.msk [vmem:[%s659_s10] sm:$0x3] %vm308_vm5, %v307_v52 }
 0x1e9   :  { %489 = dma.done.wait [#allocation3], 32  }
 0x1ea   :  { %490 = vsyncadd [#allocation3], 4294967264 }
 0x1eb   :  { %491 = dma.done.wait [#allocation5], 32  }
 0x1ec   :  { %492 = vsyncadd [#allocation5], 4294967264 }
 0x1ed   :  { %340 = vsyncpa [#allocation3], 1 }
 0x1ee   :  { %341 = vsyncpa [#allocation5], 1 }

// kernel: tile.23
= control target key start
LH: loop header
LB: loop body
LE: loop exit
PB: predicated region body
PF: predicated region fallthrough
CT: control target
= control target key end

     0   :  { %s22_s0 = inlined_call_operand.vmem [shape: f32[8], index: 0, kind: input, shape index: {}]   ;;  %s23_s1 = inlined_call_operand.vmem [shape: f32[4,8], index: 1, kind: output, shape index: {}]  }
   0x1   :  { %v4_v0 = vld [vmem:[%s22_s0] ss:$0 sm:$0xff] }
   0x2   :  { %5 = vst [vmem:[%s23_s1] sm:$0xf] %v4_v0 }

// kernel: tile.0
= control target key start
LH: loop header
LB: loop body
LE: loop exit
PB: predicated region body
PF: predicated region fallthrough
CT: control target
= control target key end

     0   :  { %s66_s8 = smov 125   ;;  %vm7_vm0 = vcmask 7168   ;;  %s67_s11 = smov 126   ;;  %s117_s0 = inlined_call_operand.vmem [shape: f32[4,8], index: 0, kind: input, shape index: {}]   ;;  %s118_s1 = inlined_call_operand.vmem [shape: f32[32,1], index: 1, kind: output, shape index: {}]  }
   0x1   :  { %v4_v0 = vld [vmem:[%s117_s0] sm:$0xf]  ;;  %s65_s0 = smov 127   ;;  %s68_s12 = smov 124  }
   0x2   :  { %5 = vst [vmem:[#allocation0] sm:$0xf] %v4_v0  ;;  %s69_s13 = smov 123   ;;  %s70_s14 = smov 122  }
   0x3   :  { %s71_s15 = smov 121  }
   0x9   :  { %v9_v1 = vld [vmem:[#allocation0] sm:$0xf]  }
   0xa   :  { %v21_v2 = vld [vmem:[#allocation0] sm:$0xf]   ;;  %10 = vrot.lane.b32.xlu0 %v9_v1, %s65_s0 }
   0xb   :  { %22 = vrot.lane.b32.xlu1 %v21_v2, %s66_s8  ;;  %v15_v3 = vld [vmem:[#allocation0] sm:$0xf]  }
   0xc   :  { %v27_v4 = vld [vmem:[#allocation0] sm:$0xf]  }
   0xd   :  { %v6_v5 = vld [vmem:[#allocation0] sm:$0xf]  }
   0xe   :  { %8 = vst.msk [vmem:[%s118_s1] ss:$8 sm:$0xf] %vm7_vm0, %v6_v5   ;;  %16 = vrot.lane.b32.xlu0 %v15_v3, %s67_s11  ;;  %v33_v6 = vld [vmem:[#allocation0] sm:$0xf]  }
   0xf   :  { %28 = vrot.lane.b32.xlu1 %v27_v4, %s68_s12  ;;  %v39_v7 = vld [vmem:[#allocation0] sm:$0xf]  }
  0x10   :  { %v45_v8 = vld [vmem:[#allocation0] sm:$0xf]  }
  0x12   :  { %34 = vrot.lane.b32.xlu0 %v33_v6, %s69_s13 }
  0x13   :  { %40 = vrot.lane.b32.xlu1 %v39_v7, %s70_s14 }
  0x16   :  { %46 = vrot.lane.b32.xlu0 %v45_v8, %s71_s15 }
  0x7c   :  { %v11_v9 = vpop.permute.xlu0 %10  }
  0x7d   :  { %v23_v10 = vpop.permute.xlu1 %22   ;;  %51 = vst.msk [vmem:[%s118_s1 + $0x1] ss:$8 sm:$0xf] %vm7_vm0, %v11_v9  }
  0x7e   :  { %53 = vst.msk [vmem:[%s118_s1 + $0x3] ss:$8 sm:$0xf] %vm7_vm0, %v23_v10  }
  0x80   :  { %v17_v11 = vpop.permute.xlu0 %16  }
  0x81   :  { %v29_v12 = vpop.permute.xlu1 %28   ;;  %52 = vst.msk [vmem:[%s118_s1 + $0x2] ss:$8 sm:$0xf] %vm7_vm0, %v17_v11  }
  0x82   :  { %54 = vst.msk [vmem:[%s118_s1 + $0x4] ss:$8 sm:$0xf] %vm7_vm0, %v29_v12  }
  0x84   :  { %v35_v13 = vpop.permute.xlu0 %34  }
  0x85   :  { %v41_v14 = vpop.permute.xlu1 %40   ;;  %55 = vst.msk [vmem:[%s118_s1 + $0x5] ss:$8 sm:$0xf] %vm7_vm0, %v35_v13  }
  0x86   :  { %56 = vst.msk [vmem:[%s118_s1 + $0x6] ss:$8 sm:$0xf] %vm7_vm0, %v41_v14  }
  0x88   :  { %v47_v15 = vpop.permute.xlu0 %46  }
  0x89   :  { %57 = vst.msk [vmem:[%s118_s1 + $0x7] ss:$8 sm:$0xf] %vm7_vm0, %v47_v15  }

// kernel: snconv2_vae_forward.14
= control target key start
LH: loop header
LB: loop body
LE: loop exit
PB: predicated region body
PF: predicated region fallthrough
CT: control target
= control target key end

     0   :  { %v263_v1 = vmov 0   ;;  %vm85_vm0 = vcmask 523264   ;;  %s322_s1 = inlined_call_operand.vmem [shape: bf16[64,128], index: 1, kind: input, shape index: {}]   ;;  %s323_s0 = inlined_call_operand.vmem [shape: bf16[32,64], index: 0, kind: input, shape index: {}]   ;;  %s324_s2 = inlined_call_operand.vmem [shape: f32[32,1], index: 2, kind: input, shape index: {}]   ;;  %s325_s3 = inlined_call_operand.vmem [shape: bf16[32,128], index: 3, kind: output, shape index: {}]  }
   0x1   :  { %v249_v0 = vld [vmem:[%s322_s1] sm:$0xff]   ;;  %248 = vset.pattern.permute.xlu1 %v263_v1  ;;  %247 = vset.pattern.permute.xlu0 %v263_v1  ;;  %v250_v2 = vld [vmem:[%s322_s1 + $0x8] sm:$0xff]   ;;  %v251_v3 = vld [vmem:[%s322_s1 + $0x10] sm:$0xff]  }
   0x2   :  { %234 = vmatprep.subr.bf16.mxu0 %v249_v0  ;;  %v253_v4 = vld [vmem:[%s323_s0] sm:$0xff]   ;;  %v29_v5 = vld [vmem:[%s324_s2 + $0x10] sm:$0xff]  ;;  %v252_v7 = vld [vmem:[%s322_s1 + $0x18] sm:$0xff]  }
   0x3   :  { %235 = vmatpush3.bf16.msra.mxu0 %v249_v0  ;;  %242 = vmatprep.mubr.msk.bf16.mxu0 %vm85_vm0, %v253_v4  ;;  %v27_v6 = vld [vmem:[%s324_s2] sm:$0xff]  ;;  %v30_v8 = vld [vmem:[%s324_s2 + $0x18] sm:$0xff]  ;;  %v28_v9 = vld [vmem:[%s324_s2 + $0x8] sm:$0xff] }
   0x4   :  { %236 = vmatprep.subr.bf16.mxu0 %v250_v2  ;;  %43 = vperm.xlu1 %248, %v29_v5   ;;  %v254_v10 = vld [vmem:[%s323_s0 + $0x8] sm:$0xff]  }
   0x5   :  { %33 = vperm.xlu0 %247, %v27_v6  }
   0x7   :  { %237 = vmatpush3.bf16.msra.mxu0 %v250_v2 }
   0x8   :  { %238 = vmatprep.subr.bf16.mxu0 %v251_v3  ;;  %48 = vperm.xlu1 %248, %v30_v8  }
   0x9   :  { %38 = vperm.xlu0 %247, %v28_v9  }
   0xb   :  { %239 = vmatpush3.bf16.msra.mxu0 %v251_v3 }
   0xc   :  { %240 = vmatprep.subr.bf16.mxu0 %v252_v7 }
   0xf   :  { %241 = vmatpush3.bf16.msra.mxu0 %v252_v7 }
  0x12   :  { %243 = vmatmul.mubr.msk.bf16.vlgmr.msra.gmra.mrb[0].mxu0 %vm85_vm0, %v254_v10 }
  0x83   :  { %v44_v11 = vpop.permute.xlu1 %43 }
  0x84   :  { %v34_v12 = vpop.permute.xlu0 %33 }
  0x87   :  { %v49_v16 = vpop.permute.xlu1 %48 }
  0x88   :  { %v39_v19 = vpop.permute.xlu0 %38 }
  0xe5   :  { %v244_v13 = vpop.f32.mrb[0].mxu0 }
  0xe6   :  { %v135_v14 = vadd.f32 %v244_v13, %v44_v11  ;;  %v126_v15 = vpop.f32.mrb[1].mxu0 }
  0xe7   :  { %v127_v17 = vadd.f32 %v126_v15, %v34_v12  ;;  %v245_v18 = vpop.f32.mrb[2].mxu0 }
  0xe8   :  { %v147_v20 = vmin.f32 %v135_v14, 0.0  ;;  %v138_v21 = vadd.f32 %v245_v18, %v49_v16  ;;  %v129_v22 = vpop.f32.mrb[3].mxu0  ;;  %vm143_vm1 = vcmp.gt.f32.partialorder %v135_v14, 0.0 }
  0xe9   :  { %v145_v23 = vmin.f32 %v127_v17, 0.0  ;;  %v130_v24 = vadd.f32 %v129_v22, %v39_v19  ;;  %vm141_vm2 = vcmp.gt.f32.partialorder %v127_v17, 0.0 }
  0xea   :  { %v153_v25 = vmul.f32 1.442695, %v147_v20  ;;  %v148_v26 = vmin.f32 %v138_v21, 0.0  ;;  %vm144_vm3 = vcmp.gt.f32.partialorder %v138_v21, 0.0 }
  0xeb   :  { %v149_v27 = vmul.f32 1.442695, %v145_v23  ;;  %v146_v28 = vmin.f32 %v130_v24, 0.0  ;;  %vm142_vm4 = vcmp.gt.f32.partialorder %v130_v24, 0.0 }
  0xec   :  { %255 = vpow2.f32 %v153_v25  ;;  %v155_v29 = vmul.f32 1.442695, %v148_v26 }
  0xed   :  { %257 = vpow2.f32 %v149_v27  ;;  %v151_v30 = vmul.f32 1.442695, %v146_v28 }
  0xee   :  { %259 = vpow2.f32 %v155_v29 }
  0xef   :  { %261 = vpow2.f32 %v151_v30 }
  0xf6   :  { %v256_v31 = vpop.eup %255 }
  0xf7   :  { %v258_v32 = vpop.eup %257  ;;  %v207_v33 = vadd.f32 -1.0, %v256_v31 }
  0xf8   :  { %v260_v34 = vpop.eup %259  ;;  %v205_v35 = vadd.f32 -1.0, %v258_v32 }
  0xf9   :  { %v262_v36 = vpop.eup %261  ;;  %v163_v37 = vmul.f32 1.6732632, %v207_v33  ;;  %v208_v38 = vadd.f32 -1.0, %v260_v34 }
  0xfa   :  { %v161_v39 = vmul.f32 1.6732632, %v205_v35  ;;  %v206_v40 = vadd.f32 -1.0, %v262_v36 }
  0xfb   :  { %v167_v41 = vsel %vm143_vm1, %v135_v14, %v163_v37  ;;  %v164_v42 = vmul.f32 1.6732632, %v208_v38 }
  0xfc   :  { %v165_v43 = vsel %vm141_vm2, %v127_v17, %v161_v39  ;;  %v162_v44 = vmul.f32 1.6732632, %v206_v40  ;;  %v171_v46 = vmul.f32 1.050701, %v167_v41 }
  0xfd   :  { %v168_v45 = vsel %vm144_vm3, %v138_v21, %v164_v42  ;;  %v169_v49 = vmul.f32 1.050701, %v165_v43 }
  0xfe   :  { %v172_v47 = vmul.f32 1.050701, %v168_v45  ;;  %v166_v48 = vsel %vm142_vm4, %v130_v24, %v162_v44 }
  0xff   :  { %v170_v50 = vmul.f32 1.050701, %v166_v48 }
 0x100   :  { %v225_v51 = vpack.c.bf16 %v172_v47, %v171_v46 }
 0x101   :  { %v220_v52 = vpack.c.bf16 %v170_v50, %v169_v49 }
 0x102   :  { %227 = vst [vmem:[%s325_s3 + $0x8] sm:$0xff] %v225_v51  }
 0x103   :  { %221 = vst [vmem:[%s325_s3] sm:$0xff] %v220_v52  }

// kernel: tile.28
= control target key start
LH: loop header
LB: loop body
LE: loop exit
PB: predicated region body
PF: predicated region fallthrough
CT: control target
= control target key end

     0   :  { %s22_s0 = inlined_call_operand.vmem [shape: f32[4], index: 0, kind: input, shape index: {}]   ;;  %s23_s1 = inlined_call_operand.vmem [shape: f32[4,4], index: 1, kind: output, shape index: {}]  }
   0x1   :  { %v4_v0 = vld [vmem:[%s22_s0] ss:$0 sm:$0xff] }
   0x2   :  { %5 = vst [vmem:[%s23_s1] sm:$0xf] %v4_v0 }

// kernel: tile.1
= control target key start
LH: loop header
LB: loop body
LE: loop exit
PB: predicated region body
PF: predicated region fallthrough
CT: control target
= control target key end

     0   :  { %s34_s8 = smov 125   ;;  %vm7_vm0 = vcmask 7168   ;;  %s35_s11 = smov 126   ;;  %s61_s0 = inlined_call_operand.vmem [shape: f32[4,4], index: 0, kind: input, shape index: {}]   ;;  %s62_s1 = inlined_call_operand.vmem [shape: f32[16,1], index: 1, kind: output, shape index: {}]  }
   0x1   :  { %v4_v0 = vld [vmem:[%s61_s0] sm:$0xf]  ;;  %s33_s0 = smov 127  }
   0x2   :  { %5 = vst [vmem:[#allocation0] sm:$0xf] %v4_v0 }
   0x9   :  { %v9_v1 = vld [vmem:[#allocation0] sm:$0xf]  }
   0xa   :  { %v21_v2 = vld [vmem:[#allocation0] sm:$0xf]   ;;  %10 = vrot.lane.b32.xlu0 %v9_v1, %s33_s0 }
   0xb   :  { %22 = vrot.lane.b32.xlu1 %v21_v2, %s34_s8  ;;  %v6_v3 = vld [vmem:[#allocation0] sm:$0xf]  }
   0xc   :  { %v15_v4 = vld [vmem:[#allocation0] sm:$0xf]   ;;  %8 = vst.msk [vmem:[%s62_s1] ss:$4 sm:$0xf] %vm7_vm0, %v6_v3  }
   0xe   :  { %16 = vrot.lane.b32.xlu0 %v15_v4, %s35_s11 }
  0x7c   :  { %v11_v5 = vpop.permute.xlu0 %10  }
  0x7d   :  { %v23_v6 = vpop.permute.xlu1 %22   ;;  %27 = vst.msk [vmem:[%s62_s1 + $0x1] ss:$4 sm:$0xf] %vm7_vm0, %v11_v5  }
  0x7e   :  { %29 = vst.msk [vmem:[%s62_s1 + $0x3] ss:$4 sm:$0xf] %vm7_vm0, %v23_v6  }
  0x80   :  { %v17_v7 = vpop.permute.xlu0 %16  }
  0x81   :  { %28 = vst.msk [vmem:[%s62_s1 + $0x2] ss:$4 sm:$0xf] %vm7_vm0, %v17_v7  }

// kernel: snconv2_vae_forward.15
= control target key start
LH: loop header
LB: loop body
LE: loop exit
PB: predicated region body
PF: predicated region fallthrough
CT: control target
= control target key end

     0   :  { %v162_v0 = vmov 0.0   ;;  %vm163_vm0 = vmmov 0   ;;  %v164_v2 = vmov 0   ;;  %vm50_vm1 = vcmask 261120   ;;  %s203_s1 = inlined_call_operand.vmem [shape: bf16[32,128], index: 1, kind: input, shape index: {}]   ;;  %s204_s2 = inlined_call_operand.vmem [shape: f32[16,1], index: 2, kind: input, shape index: {}]   ;;  %s205_s0 = inlined_call_operand.vmem [shape: bf16[16,32], index: 0, kind: input, shape index: {}]   ;;  %s206_s3 = inlined_call_operand.vmem [shape: bf16[16,128], index: 3, kind: output, shape index: {}]  }
   0x1   :  { %143 = vmatprep.subr.bf16.mxu0 %v162_v0  ;;  %v155_v1 = vld [vmem:[%s203_s1] sm:$0xff]   ;;  %147 = vmatprep.mubr.msk.bf16.mxu0 %vm163_vm0, %v162_v0  ;;  %v156_v3 = vld [vmem:[%s203_s1 + $0x8] sm:$0xff]  }
   0x2   :  { %154 = vset.pattern.permute.xlu0 %v164_v2  ;;  %144 = vmatpush3.bf16.msra.mxu0 %v155_v1  ;;  %v21_v4 = vld [vmem:[%s204_s2] sm:$0xff]  ;;  %v22_v6 = vld [vmem:[%s204_s2 + $0x8] sm:$0xff] }
   0x3   :  { %145 = vmatprep.subr.bf16.mxu0 %v162_v0  ;;  %25 = vperm.xlu0 %154, %v21_v4   ;;  %v157_v5 = vld [vmem:[%s205_s0] sm:$0xff]  }
   0x6   :  { %146 = vmatpush3.bf16.msra.mxu0 %v156_v3 }
   0x7   :  { %30 = vperm.xlu0 %154, %v22_v6  }
   0x9   :  { %148 = vmatmul.mubr.msk.bf16.vlgmr.msra.gmra.mrb[0].mxu0 %vm50_vm1, %v157_v5 }
  0x82   :  { %v26_v7 = vpop.permute.xlu0 %25 }
  0x86   :  { %v31_v11 = vpop.permute.xlu0 %30 }
  0xdc   :  { %v88_v8 = vpop.f32.mrb[0].mxu0 }
  0xdd   :  { %v89_v9 = vadd.f32 %v88_v8, %v26_v7  ;;  %v149_v10 = vpop.f32.mrb[1].mxu0 }
  0xde   :  { %v91_v12 = vpop.f32.mrb[2].mxu0 }
  0xdf   :  { %v97_v13 = vmin.f32 %v89_v9, 0.0  ;;  %v92_v14 = vadd.f32 %v91_v12, %v31_v11  ;;  %v150_v15 = vpop.f32.mrb[3].mxu0  ;;  %vm95_vm2 = vcmp.gt.f32.partialorder %v89_v9, 0.0 }
  0xe1   :  { %v99_v16 = vmul.f32 1.442695, %v97_v13  ;;  %v98_v17 = vmin.f32 %v92_v14, 0.0  ;;  %vm96_vm3 = vcmp.gt.f32.partialorder %v92_v14, 0.0 }
  0xe3   :  { %158 = vpow2.f32 %v99_v16  ;;  %v101_v18 = vmul.f32 1.442695, %v98_v17 }
  0xe5   :  { %160 = vpow2.f32 %v101_v18 }
  0xed   :  { %v159_v19 = vpop.eup %158 }
  0xee   :  { %v129_v20 = vadd.f32 -1.0, %v159_v19 }
  0xef   :  { %v161_v21 = vpop.eup %160 }
  0xf0   :  { %v105_v22 = vmul.f32 1.6732632, %v129_v20  ;;  %v130_v23 = vadd.f32 -1.0, %v161_v21 }
  0xf2   :  { %v107_v24 = vsel %vm95_vm2, %v89_v9, %v105_v22  ;;  %v106_v25 = vmul.f32 1.6732632, %v130_v23 }
  0xf3   :  { %v109_v27 = vmul.f32 1.050701, %v107_v24 }
  0xf4   :  { %v108_v26 = vsel %vm96_vm3, %v92_v14, %v106_v25 }
  0xf5   :  { %v110_v28 = vmul.f32 1.050701, %v108_v26 }
  0xf7   :  { %v138_v29 = vpack.c.bf16 %v110_v28, %v109_v27 }
  0xf9   :  { %139 = vst [vmem:[%s206_s3] sm:$0xff] %v138_v29  }

// kernel: tile.33
= control target key start
LH: loop header
LB: loop body
LE: loop exit
PB: predicated region body
PF: predicated region fallthrough
CT: control target
= control target key end

     0   :  { %s22_s0 = inlined_call_operand.vmem [shape: f32[2], index: 0, kind: input, shape index: {}]   ;;  %s23_s1 = inlined_call_operand.vmem [shape: f32[4,2], index: 1, kind: output, shape index: {}]  }
   0x1   :  { %v4_v0 = vld [vmem:[%s22_s0] ss:$0 sm:$0xff] }
   0x2   :  { %5 = vst [vmem:[%s23_s1] sm:$0xf] %v4_v0 }

// kernel: tile.2
= control target key start
LH: loop header
LB: loop body
LE: loop exit
PB: predicated region body
PF: predicated region fallthrough
CT: control target
= control target key end

     0   :  { %vm7_vm0 = vcmask 7168   ;;  %s37_s0 = inlined_call_operand.vmem [shape: f32[4,2], index: 0, kind: input, shape index: {}]   ;;  %s38_s1 = inlined_call_operand.vmem [shape: f32[8,1], index: 1, kind: output, shape index: {}]  }
   0x1   :  { %v4_v0 = vld [vmem:[%s37_s0] sm:$0xf]  ;;  %s17_s0 = smov 127  }
   0x2   :  { %5 = vst [vmem:[#allocation0] sm:$0xf] %v4_v0 }
   0x9   :  { %v9_v1 = vld [vmem:[#allocation0] sm:$0xf]  }
   0xa   :  { %v6_v2 = vld [vmem:[#allocation0] sm:$0xf]   ;;  %10 = vrot.lane.b32.xlu0 %v9_v1, %s17_s0 }
   0xb   :  { %8 = vst.msk [vmem:[%s38_s1] ss:$2 sm:$0xf] %vm7_vm0, %v6_v2  }
  0x7c   :  { %v11_v3 = vpop.permute.xlu0 %10  }
  0x7d   :  { %15 = vst.msk [vmem:[%s38_s1 + $0x1] ss:$2 sm:$0xf] %vm7_vm0, %v11_v3  }

// kernel: snconv2_vae_forward.16
= control target key start
LH: loop header
LB: loop body
LE: loop exit
PB: predicated region body
PF: predicated region fallthrough
CT: control target
= control target key end

     0   :  { %v204_v0 = vmov 0.0   ;;  %vm205_vm0 = vmmov 0   ;;  %v206_v3 = vmov 0   ;;  %vm42_vm1 = vcmask 130048   ;;  %s248_s1 = inlined_call_operand.vmem [shape: bf16[16,384], index: 1, kind: input, shape index: {}]   ;;  %s249_s2 = inlined_call_operand.vmem [shape: f32[8,1], index: 2, kind: input, shape index: {}]   ;;  %s250_s0 = inlined_call_operand.vmem [shape: bf16[8,16], index: 0, kind: input, shape index: {}]   ;;  %s251_s3 = inlined_call_operand.vmem [shape: bf16[8,384], index: 3, kind: output, shape index: {}]  }
   0x1   :  { %184 = vmatprep.subr.bf16.mxu1 %v204_v0  ;;  %v194_v1 = vld [vmem:[%s248_s1 + $0x4] ss:$12 sps:$4 sm:$0xff]   ;;  %186 = vmatprep.mubr.msk.bf16.mxu1 %vm205_vm0, %v204_v0  ;;  %v196_v2 = vld [vmem:[%s248_s1 + $0x8] ss:$12 sps:$4 sm:$0xff]   ;;  %v197_v4 = vld [vmem:[%s248_s1] ss:$12 sps:$4 sm:$0xff]  }
   0x2   :  { %78 = vmatprep.mubr.bf16.mxu0 %v206_v3  ;;  %193 = vset.pattern.permute.xlu0 %v206_v3  ;;  %v20_v5 = vld [vmem:[%s249_s2] sm:$0xff] }
   0x3   :  { %46 = vmatprep.subr.bf16.mxu0 %v194_v1  ;;  %185 = vmatpush3.bf16.msra.mxu1 %v196_v2  ;;  %v15_v6 = vld [vmem:[%s250_s0] sm:$0xf] }
   0x4   :  { %23 = vperm.xlu0 %193, %v20_v5   ;;  %47 = vmatpush1.bf16.msra.mxu0 %v197_v4 }
   0x6   :  { %187 = vmatmul.mubr.msk.bf16.vlgmr.msra.gmra.mrb[0].mxu1 %vm42_vm1, %v15_v6 }
   0x7   :  { %173 = vmatmul.mubr.msk.bf16.vlgmr.msra.gmra.mrb[0].mxu0 %vm42_vm1, %v15_v6 }
  0x83   :  { %v24_v7 = vpop.permute.xlu0 %23 }
  0xd9   :  { %v121_v8 = vpop.f32.mrb[0].mxu1 }
  0xda   :  { %v122_v9 = vadd.f32 %v121_v8, %v24_v7  ;;  %v80_v10 = vpop.f32.mrb[0].mxu0  ;;  %v188_v11 = vpop.f32.mrb[1].mxu1 }
  0xdb   :  { %v81_v12 = vadd.f32 %v80_v10, %v24_v7  ;;  %v82_v13 = vpop.f32.mrb[1].mxu0  ;;  %v124_v14 = vpop.f32.mrb[2].mxu1 }
  0xdc   :  { %v132_v15 = vmin.f32 %v122_v9, 0.0  ;;  %v83_v16 = vadd.f32 %v82_v13, %v24_v7  ;;  %v84_v17 = vpop.f32.mrb[2].mxu0  ;;  %v189_v18 = vpop.f32.mrb[3].mxu1  ;;  %vm129_vm2 = vcmp.gt.f32.partialorder %v122_v9, 0.0 }
  0xdd   :  { %v130_v19 = vmin.f32 %v81_v12, 0.0  ;;  %v85_v20 = vpop.f32.mrb[3].mxu0  ;;  %vm127_vm3 = vcmp.gt.f32.partialorder %v81_v12, 0.0 }
  0xde   :  { %v137_v21 = vmul.f32 1.442695, %v132_v15  ;;  %v131_v22 = vmin.f32 %v83_v16, 0.0  ;;  %vm128_vm4 = vcmp.gt.f32.partialorder %v83_v16, 0.0 }
  0xdf   :  { %v133_v23 = vmul.f32 1.442695, %v130_v19 }
  0xe0   :  { %198 = vpow2.f32 %v137_v21  ;;  %v135_v24 = vmul.f32 1.442695, %v131_v22 }
  0xe1   :  { %200 = vpow2.f32 %v133_v23 }
  0xe2   :  { %202 = vpow2.f32 %v135_v24 }
  0xea   :  { %v199_v25 = vpop.eup %198 }
  0xeb   :  { %v201_v26 = vpop.eup %200  ;;  %v177_v27 = vadd.f32 -1.0, %v199_v25 }
  0xec   :  { %v203_v28 = vpop.eup %202  ;;  %v175_v29 = vadd.f32 -1.0, %v201_v26 }
  0xed   :  { %v144_v30 = vmul.f32 1.6732632, %v177_v27  ;;  %v176_v31 = vadd.f32 -1.0, %v203_v28 }
  0xee   :  { %v142_v32 = vmul.f32 1.6732632, %v175_v29 }
  0xef   :  { %v147_v33 = vsel %vm129_vm2, %v122_v9, %v144_v30  ;;  %v143_v34 = vmul.f32 1.6732632, %v176_v31 }
  0xf0   :  { %v150_v35 = vmul.f32 1.050701, %v147_v33  ;;  %v145_v36 = vsel %vm127_vm3, %v81_v12, %v142_v32 }
  0xf1   :  { %v148_v37 = vmul.f32 1.050701, %v145_v36  ;;  %v146_v38 = vsel %vm128_vm4, %v83_v16, %v143_v34 }
  0xf2   :  { %v181_v39 = vpack.c.bf16 %v150_v35, %v150_v35  ;;  %v149_v40 = vmul.f32 1.050701, %v146_v38 }
  0xf4   :  { %165 = vst [vmem:[%s251_s3 + $0x8] sm:$0xf] %v181_v39  ;;  %v180_v41 = vpack.c.bf16 %v149_v40, %v148_v37 }
  0xf6   :  { %164 = vst [vmem:[%s251_s3] sm:$0xff] %v180_v41 }

// kernel: tile.38
= control target key start
LH: loop header
LB: loop body
LE: loop exit
PB: predicated region body
PF: predicated region fallthrough
CT: control target
= control target key end

     0   :  { %s22_s0 = inlined_call_operand.vmem [shape: f32[3], index: 0, kind: input, shape index: {}]   ;;  %s23_s1 = inlined_call_operand.vmem [shape: f32[4,3], index: 1, kind: output, shape index: {}]  }
   0x1   :  { %v4_v0 = vld [vmem:[%s22_s0] ss:$0 sm:$0xff] }
   0x2   :  { %5 = vst [vmem:[%s23_s1] sm:$0xf] %v4_v0 }

// kernel: tile.3
= control target key start
LH: loop header
LB: loop body
LE: loop exit
PB: predicated region body
PF: predicated region fallthrough
CT: control target
= control target key end

     0   :  { %vm7_vm0 = vcmask 7168   ;;  %s26_s10 = smov 126   ;;  %s49_s0 = inlined_call_operand.vmem [shape: f32[4,3], index: 0, kind: input, shape index: {}]   ;;  %s50_s1 = inlined_call_operand.vmem [shape: f32[12,1], index: 1, kind: output, shape index: {}]  }
   0x1   :  { %v4_v0 = vld [vmem:[%s49_s0] sm:$0xf]  ;;  %s25_s0 = smov 127  }
   0x2   :  { %5 = vst [vmem:[#allocation0] sm:$0xf] %v4_v0 }
   0x9   :  { %v9_v1 = vld [vmem:[#allocation0] sm:$0xf]  }
   0xa   :  { %v6_v2 = vld [vmem:[#allocation0] sm:$0xf]   ;;  %10 = vrot.lane.b32.xlu0 %v9_v1, %s25_s0 }
   0xb   :  { %8 = vst.msk [vmem:[%s50_s1] ss:$3 sm:$0xf] %vm7_vm0, %v6_v2   ;;  %v15_v3 = vld [vmem:[#allocation0] sm:$0xf]  }
   0xe   :  { %16 = vrot.lane.b32.xlu0 %v15_v3, %s26_s10 }
  0x7c   :  { %v11_v4 = vpop.permute.xlu0 %10  }
  0x7d   :  { %21 = vst.msk [vmem:[%s50_s1 + $0x1] ss:$3 sm:$0xf] %vm7_vm0, %v11_v4  }
  0x80   :  { %v17_v5 = vpop.permute.xlu0 %16  }
  0x81   :  { %22 = vst.msk [vmem:[%s50_s1 + $0x2] ss:$3 sm:$0xf] %vm7_vm0, %v17_v5  }

// kernel: snconv2_vae_forward.17
= control target key start
LH: loop header
LB: loop body
LE: loop exit
PB: predicated region body
PF: predicated region fallthrough
CT: control target
= control target key end

     0   :  { %vm66_vm0 = vcmask 1043456   ;;  %v550_v1 = vmov 0   ;;  %vm62_vm1 = vcmask 64512   ;;  %v551_v21 = vmov 0.0   ;;  %s687_s1 = inlined_call_operand.vmem [shape: bf16[8,1152], index: 1, kind: input, shape index: {}]   ;;  %s688_s0 = inlined_call_operand.vmem [shape: bf16[12,8], index: 0, kind: input, shape index: {}]   ;;  %s689_s2 = inlined_call_operand.vmem [shape: f32[12,1], index: 2, kind: input, shape index: {}]   ;;  %s690_s3 = inlined_call_operand.vmem [shape: f32[12,1152], index: 3, kind: output, shape index: {}]  }
   0x1   :  { %v17_v0 = vld [vmem:[%s687_s1] sm:$0xff]  ;;  %126 = vmatprep.mubr.bf16.mxu0 %v550_v1  ;;  %169 = vmatprep.mubr.bf16.mxu1 %v550_v1  ;;  %v18_v4 = vld [vmem:[%s687_s1 + $0x8] sm:$0xff]  ;;  %v19_v5 = vld [vmem:[%s687_s1 + $0x10] sm:$0xff]  ;;  %vm552_vm2 = vmmov 0  }
   0x2   :  { %v439_v2 = vcombine.high %v17_v0, %v17_v0  ;;  %v438_v3 = vcombine.low %v17_v0, %v17_v0  ;;  %467 = vset.pattern.permute.xlu0 %v550_v1  ;;  %v441_v6 = vcombine.high %v18_v4, %v18_v4  ;;  %v443_v7 = vcombine.high %v19_v5, %v19_v5  ;;  %v20_v10 = vld [vmem:[%s687_s1 + $0x18] sm:$0xff]  ;;  %v470_v12 = vld [vmem:[%s688_s0] sm:$0x3f]   ;;  %v23_v19 = vld [vmem:[%s689_s2 + $0x8] sm:$0xf] }
   0x3   :  { %v440_v8 = vcombine.low %v18_v4, %v18_v4  ;;  %v442_v9 = vcombine.low %v19_v5, %v19_v5  ;;  %v445_v13 = vcombine.high %v20_v10, %v20_v10  ;;  %v444_v14 = vcombine.low %v20_v10, %v20_v10  ;;  %v22_v15 = vld [vmem:[%s689_s2] sm:$0xff] }
   0x4   :  { %447 = vmatprep.subr.msk.bf16.mxu0 %vm66_vm0, %v439_v2  ;;  %v68_v11 = vsel %vm66_vm0, %v438_v3, 0  ;;  %449 = vmatprep.subr.msk.bf16.mxu1 %vm66_vm0, %v441_v6  ;;  %v477_v20 = vld [vmem:[%s687_s1 + $0x20] ss:$0 sps:$4 sm:$0xff]  }
   0x5   :  { %95 = vmatpush1.bf16.msra.mxu0 %v68_v11  ;;  %v74_v16 = vsel %vm66_vm0, %v440_v8, 0  ;;  %v80_v17 = vsel %vm66_vm0, %v442_v9, 0  ;;  %v86_v18 = vsel %vm66_vm0, %v444_v14, 0  ;;  %26 = vperm.xlu0 %467, %v22_v15   ;;  %v92_v22 = vsel %vm66_vm0, %v477_v20, 0 }
   0x6   :  { %451 = vmatprep.subr.msk.bf16.mxu0 %vm66_vm0, %v443_v7  ;;  %138 = vmatpush1.bf16.msra.mxu1 %v74_v16 }
   0x7   :  { %453 = vmatprep.subr.msk.bf16.mxu1 %vm66_vm0, %v445_v13 }
   0x8   :  { %448 = vmatmul.mubr.msk.bf16.vlgmr.msra.gmra.mrb[0].mxu0 %vm62_vm1, %v470_v12 }
   0x9   :  { %181 = vmatpush1.bf16.msra.mxu0 %v80_v17  ;;  %450 = vmatmul.mubr.msk.bf16.vlgmr.msra.gmra.mrb[0].mxu1 %vm62_vm1, %v470_v12 }
   0xa   :  { %212 = vmatprep.mubr.bf16.mxu0 %v550_v1  ;;  %224 = vmatpush1.bf16.msra.mxu1 %v86_v18 }
   0xb   :  { %458 = vmatprep.subr.bf16.mxu0 %v551_v21  ;;  %255 = vmatprep.mubr.bf16.mxu1 %v550_v1 }
   0xc   :  { %31 = vperm.xlu0 %467, %v23_v19  }
  0x10   :  { %452 = vmatmul.mubr.msk.bf16.vlgmr.msra.gmra.mrb[4].mxu0 %vm62_vm1, %v470_v12 }
  0x11   :  { %459 = vmatpush3.bf16.msra.mxu0 %v92_v22  ;;  %454 = vmatmul.mubr.msk.bf16.vlgmr.msra.gmra.mrb[4].mxu1 %vm62_vm1, %v470_v12 }
  0x12   :  { %460 = vmatprep.mubr.msk.bf16.mxu0 %vm552_vm2, %v551_v21 }
  0x18   :  { %461 = vmatmul.mubr.msk.bf16.vlgmr.msra.gmra.mrb[8].mxu0 %vm62_vm1, %v470_v12 }
  0x84   :  { %v611_v23 = vpop.permute.xlu0 %26 }
  0x8b   :  { %v613_v25 = vpop.permute.xlu0 %31 }
  0xdb   :  { %v128_v24 = vpop.f32.mrb[0].mxu0 }
  0xdc   :  { %v129_v26 = vadd.f32 %v128_v24, %v611_v23  ;;  %v130_v27 = vpop.f32.mrb[1].mxu0  ;;  %v171_v28 = vpop.f32.mrb[0].mxu1 }
  0xdd   :  { %v131_v29 = vadd.f32 %v130_v27, %v611_v23  ;;  %v132_v30 = vpop.f32.mrb[2].mxu0  ;;  %v172_v31 = vadd.f32 %v171_v28, %v611_v23  ;;  %v173_v32 = vpop.f32.mrb[1].mxu1 }
  0xde   :  { %v307_v33 = vsub.f32 0.0, %v129_v26  ;;  %v133_v34 = vadd.f32 %v132_v30, %v613_v25  ;;  %v134_v35 = vpop.f32.mrb[3].mxu0  ;;  %v174_v36 = vadd.f32 %v173_v32, %v611_v23  ;;  %v175_v37 = vpop.f32.mrb[2].mxu1 }
  0xdf   :  { %v308_v38 = vsub.f32 0.0, %v131_v29  ;;  %v135_v39 = vadd.f32 %v134_v35, %v613_v25  ;;  %v309_v40 = vsub.f32 0.0, %v172_v31  ;;  %v176_v41 = vadd.f32 %v175_v37, %v613_v25  ;;  %v177_v42 = vpop.f32.mrb[3].mxu1 }
  0xe0   :  { %v325_v43 = vmin.f32 %v307_v33, 30.0  ;;  %v316_v44 = vsub.f32 0.0, %v133_v34  ;;  %v310_v45 = vsub.f32 0.0, %v174_v36  ;;  %v178_v46 = vadd.f32 %v177_v42, %v613_v25 }
  0xe1   :  { %v326_v47 = vmin.f32 %v308_v38, 30.0  ;;  %v317_v48 = vsub.f32 0.0, %v135_v39  ;;  %v327_v49 = vmin.f32 %v309_v40, 30.0  ;;  %v318_v50 = vsub.f32 0.0, %v176_v41 }
  0xe2   :  { %v343_v51 = vmul.f32 1.442695, %v325_v43  ;;  %v334_v52 = vmin.f32 %v316_v44, 30.0  ;;  %v328_v53 = vmin.f32 %v310_v45, 30.0  ;;  %v319_v54 = vsub.f32 0.0, %v178_v46 }
  0xe3   :  { %v345_v55 = vmul.f32 1.442695, %v326_v47  ;;  %v335_v56 = vmin.f32 %v317_v48, 30.0  ;;  %v336_v57 = vmin.f32 %v318_v50, 30.0  ;;  %v347_v59 = vmul.f32 1.442695, %v327_v49 }
  0xe4   :  { %478 = vpow2.f32 %v343_v51  ;;  %v361_v58 = vmul.f32 1.442695, %v334_v52  ;;  %v337_v60 = vmin.f32 %v319_v54, 30.0  ;;  %v214_v61 = vpop.f32.mrb[4].mxu0  ;;  %v349_v63 = vmul.f32 1.442695, %v328_v53 }
  0xe5   :  { %480 = vpow2.f32 %v345_v55  ;;  %v363_v62 = vmul.f32 1.442695, %v335_v56  ;;  %v215_v0 = vadd.f32 %v214_v61, %v611_v23  ;;  %v216_v1 = vpop.f32.mrb[5].mxu0  ;;  %v257_v2 = vpop.f32.mrb[4].mxu1  ;;  %v365_v3 = vmul.f32 1.442695, %v336_v57 }
  0xe6   :  { %482 = vpow2.f32 %v361_v58  ;;  %v217_v4 = vadd.f32 %v216_v1, %v611_v23  ;;  %v218_v5 = vpop.f32.mrb[6].mxu0  ;;  %v259_v6 = vpop.f32.mrb[5].mxu1  ;;  %v367_v7 = vmul.f32 1.442695, %v337_v60  ;;  %v258_v17 = vadd.f32 %v257_v2, %v611_v23 }
  0xe7   :  { %484 = vpow2.f32 %v363_v62  ;;  %v311_v8 = vsub.f32 0.0, %v215_v0  ;;  %v219_v9 = vadd.f32 %v218_v5, %v613_v25  ;;  %v220_v10 = vpop.f32.mrb[7].mxu0  ;;  %v261_v11 = vpop.f32.mrb[6].mxu1  ;;  %v260_v33 = vadd.f32 %v259_v6, %v611_v23 }
  0xe8   :  { %486 = vpow2.f32 %v347_v59  ;;  %v312_v12 = vsub.f32 0.0, %v217_v4  ;;  %v221_v13 = vadd.f32 %v220_v10, %v613_v25  ;;  %v263_v14 = vpop.f32.mrb[7].mxu1  ;;  %v313_v29 = vsub.f32 0.0, %v258_v17 }
  0xe9   :  { %488 = vpow2.f32 %v349_v63  ;;  %v329_v15 = vmin.f32 %v311_v8, 30.0  ;;  %v320_v16 = vsub.f32 0.0, %v219_v9  ;;  %v262_v37 = vadd.f32 %v261_v11, %v613_v25 }
  0xea   :  { %490 = vpow2.f32 %v365_v3  ;;  %v330_v18 = vmin.f32 %v312_v12, 30.0  ;;  %v321_v19 = vsub.f32 0.0, %v221_v13  ;;  %v264_v40 = vadd.f32 %v263_v14, %v613_v25 }
  0xeb   :  { %492 = vpow2.f32 %v367_v7  ;;  %v351_v20 = vmul.f32 1.442695, %v329_v15  ;;  %v338_v21 = vmin.f32 %v320_v16, 30.0  ;;  %v300_v22 = vpop.f32.mrb[8].mxu0  ;;  %v331_v43 = vmin.f32 %v313_v29, 30.0 }
  0xec   :  { %v353_v24 = vmul.f32 1.442695, %v330_v18  ;;  %v339_v26 = vmin.f32 %v321_v19, 30.0  ;;  %v462_v27 = vpop.f32.mrb[9].mxu0  ;;  %v301_v44 = vadd.f32 %v300_v22, %v611_v23  ;;  %v314_v47 = vsub.f32 0.0, %v260_v33 }
  0xed   :  { %494 = vpow2.f32 %v351_v20  ;;  %v369_v28 = vmul.f32 1.442695, %v338_v21  ;;  %v303_v30 = vpop.f32.mrb[10].mxu0  ;;  %v322_v51 = vsub.f32 0.0, %v262_v37  ;;  %v323_v54 = vsub.f32 0.0, %v264_v40 }
  0xee   :  { %v479_v31 = vpop.eup %478  ;;  %496 = vpow2.f32 %v353_v24  ;;  %v371_v32 = vmul.f32 1.442695, %v339_v26  ;;  %v463_v34 = vpop.f32.mrb[11].mxu0  ;;  %v304_v48 = vadd.f32 %v303_v30, %v613_v25  ;;  %v355_v57 = vmul.f32 1.442695, %v331_v43 }
  0xef   :  { %v481_v35 = vpop.eup %480  ;;  %v379_v36 = vadd.f32 1.0, %v479_v31  ;;  %498 = vpow2.f32 %v369_v28  ;;  %v315_v58 = vsub.f32 0.0, %v301_v44  ;;  %v332_v59 = vmin.f32 %v314_v47, 30.0 }
  0xf0   :  { %v483_v38 = vpop.eup %482  ;;  %v380_v39 = vadd.f32 1.0, %v481_v35  ;;  %500 = vpow2.f32 %v371_v32  ;;  %v324_v60 = vsub.f32 0.0, %v304_v48  ;;  %v340_v25 = vmin.f32 %v322_v51, 30.0 }
  0xf1   :  { %v485_v41 = vpop.eup %484  ;;  %502 = vrcp.f32 %v379_v36  ;;  %v388_v42 = vadd.f32 1.0, %v483_v38  ;;  %v341_v0 = vmin.f32 %v323_v54, 30.0  ;;  %v333_v3 = vmin.f32 %v315_v58, 30.0 }
  0xf2   :  { %v487_v45 = vpop.eup %486  ;;  %504 = vrcp.f32 %v380_v39  ;;  %v389_v46 = vadd.f32 1.0, %v485_v41  ;;  %v357_v6 = vmul.f32 1.442695, %v332_v59  ;;  %v342_v7 = vmin.f32 %v324_v60, 30.0 }
  0xf3   :  { %v489_v49 = vpop.eup %488  ;;  %506 = vrcp.f32 %v388_v42  ;;  %v381_v50 = vadd.f32 1.0, %v487_v45  ;;  %v373_v10 = vmul.f32 1.442695, %v340_v25  ;;  %v375_v12 = vmul.f32 1.442695, %v341_v0 }
  0xf4   :  { %v491_v52 = vpop.eup %490  ;;  %508 = vrcp.f32 %v389_v46  ;;  %v382_v53 = vadd.f32 1.0, %v489_v49  ;;  %v359_v14 = vmul.f32 1.442695, %v333_v3  ;;  %v377_v16 = vmul.f32 1.442695, %v342_v7 }
  0xf5   :  { %v493_v55 = vpop.eup %492  ;;  %510 = vrcp.f32 %v381_v50  ;;  %v390_v56 = vadd.f32 1.0, %v491_v52 }
  0xf6   :  { %512 = vrcp.f32 %v382_v53  ;;  %v391_v23 = vadd.f32 1.0, %v493_v55 }
  0xf7   :  { %v495_v61 = vpop.eup %494  ;;  %514 = vrcp.f32 %v390_v56 }
  0xf8   :  { %v497_v62 = vpop.eup %496  ;;  %516 = vrcp.f32 %v391_v23  ;;  %v383_v63 = vadd.f32 1.0, %v495_v61 }
  0xf9   :  { %v499_v1 = vpop.eup %498  ;;  %v384_v2 = vadd.f32 1.0, %v497_v62  ;;  %518 = vpow2.f32 %v355_v57 }
  0xfa   :  { %v501_v4 = vpop.eup %500  ;;  %520 = vrcp.f32 %v383_v63  ;;  %v392_v5 = vadd.f32 1.0, %v499_v1 }
  0xfb   :  { %v503_v8 = vpop.eup %502  ;;  %522 = vrcp.f32 %v384_v2  ;;  %v393_v9 = vadd.f32 1.0, %v501_v4 }
  0xfc   :  { %v505_v11 = vpop.eup %504  ;;  %415 = vst [vmem:[%s690_s3] sm:$0xff] %v503_v8  ;;  %524 = vrcp.f32 %v392_v5 }
  0xfd   :  { %v507_v13 = vpop.eup %506  ;;  %416 = vst [vmem:[%s690_s3 + $0x8] sm:$0xff] %v505_v11  ;;  %526 = vrcp.f32 %v393_v9 }
  0xfe   :  { %v509_v15 = vpop.eup %508  ;;  %424 = vst [vmem:[%s690_s3 + $0x48] sm:$0xf] %v507_v13  ;;  %528 = vpow2.f32 %v357_v6 }
  0xff   :  { %v511_v17 = vpop.eup %510  ;;  %425 = vst [vmem:[%s690_s3 + $0x50] sm:$0xf] %v509_v15  ;;  %530 = vpow2.f32 %v373_v10 }
 0x100   :  { %v513_v18 = vpop.eup %512  ;;  %417 = vst [vmem:[%s690_s3 + $0x10] sm:$0xff] %v511_v17  ;;  %532 = vpow2.f32 %v375_v12 }
 0x101   :  { %v515_v19 = vpop.eup %514  ;;  %418 = vst [vmem:[%s690_s3 + $0x18] sm:$0xff] %v513_v18  ;;  %534 = vpow2.f32 %v359_v14 }
 0x102   :  { %v517_v20 = vpop.eup %516  ;;  %426 = vst [vmem:[%s690_s3 + $0x58] sm:$0xf] %v515_v19  ;;  %536 = vpow2.f32 %v377_v16 }
 0x103   :  { %v519_v21 = vpop.eup %518  ;;  %427 = vst [vmem:[%s690_s3 + $0x60] sm:$0xf] %v517_v20 }
 0x104   :  { %v521_v22 = vpop.eup %520  ;;  %v385_v24 = vadd.f32 1.0, %v519_v21 }
 0x105   :  { %v523_v26 = vpop.eup %522  ;;  %419 = vst [vmem:[%s690_s3 + $0x20] sm:$0xff] %v521_v22 }
 0x106   :  { %v525_v27 = vpop.eup %524  ;;  %420 = vst [vmem:[%s690_s3 + $0x28] sm:$0xff] %v523_v26  ;;  %538 = vrcp.f32 %v385_v24 }
 0x107   :  { %v527_v28 = vpop.eup %526  ;;  %428 = vst [vmem:[%s690_s3 + $0x68] sm:$0xf] %v525_v27 }
 0x108   :  { %v529_v29 = vpop.eup %528  ;;  %429 = vst [vmem:[%s690_s3 + $0x70] sm:$0xf] %v527_v28 }
 0x109   :  { %v531_v30 = vpop.eup %530  ;;  %v386_v31 = vadd.f32 1.0, %v529_v29 }
 0x10a   :  { %v533_v32 = vpop.eup %532  ;;  %v394_v33 = vadd.f32 1.0, %v531_v30 }
 0x10b   :  { %v535_v34 = vpop.eup %534  ;;  %540 = vrcp.f32 %v386_v31  ;;  %v395_v35 = vadd.f32 1.0, %v533_v32 }
 0x10c   :  { %v537_v36 = vpop.eup %536  ;;  %542 = vrcp.f32 %v394_v33  ;;  %v387_v37 = vadd.f32 1.0, %v535_v34 }
 0x10d   :  { %544 = vrcp.f32 %v395_v35  ;;  %v396_v38 = vadd.f32 1.0, %v537_v36 }
 0x10e   :  { %546 = vrcp.f32 %v387_v37 }
 0x10f   :  { %548 = vrcp.f32 %v396_v38 }
 0x110   :  { %v539_v39 = vpop.eup %538 }
 0x111   :  { %421 = vst [vmem:[%s690_s3 + $0x30] sm:$0xff] %v539_v39 }
 0x115   :  { %v541_v40 = vpop.eup %540 }
 0x116   :  { %v543_v41 = vpop.eup %542  ;;  %422 = vst [vmem:[%s690_s3 + $0x38] sm:$0xff] %v541_v40 }
 0x117   :  { %v545_v42 = vpop.eup %544  ;;  %430 = vst [vmem:[%s690_s3 + $0x78] sm:$0xf] %v543_v41 }
 0x118   :  { %v547_v43 = vpop.eup %546  ;;  %431 = vst [vmem:[%s690_s3 + $0x80] sm:$0xf] %v545_v42 }
 0x119   :  { %v549_v44 = vpop.eup %548  ;;  %423 = vst [vmem:[%s690_s3 + $0x40] sm:$0xff] %v547_v43 }
 0x11a   :  { %432 = vst [vmem:[%s690_s3 + $0x88] sm:$0xf] %v549_v44 }

</bundles_post_ra>
